<compile_context>
chip_gen: v6e
topology: v6e:2x2x1
jax: 0.10.0
libtpu: 0.0.40
codegen_flags: <defaults>
</compile_context>

<pallas_src>
import math
import numpy as np
import jax
import jax.numpy as jnp
from jax.experimental import pallas as pl
from jax.experimental.pallas import tpu as pltpu

# ---------------- model dimensions (small, consistent with the module) --------
B, T, D, H, NFF = 2, 8, 32, 4, 64        # batch, block_size(seq), d_model, n_head, n_ff
HS = D // H                              # head_size
DP = 128                                 # lane-padded model width (multiple of 128)
EPS = 1e-6                               # norm_eps
SQRT_HS = math.sqrt(HS)                  # reference divides by 1/sqrt(hs) => multiply
GELU_C = math.sqrt(2.0 / math.pi)


# ------------------------------- kernel ---------------------------------------
def _rmsnorm(x, w):
    # x: (T, DP) with zero padding beyond D, w: (1, DP) zero-padded.
    ms = jnp.sum(x * x, axis=-1, keepdims=True) * (1.0 / D)
    return x * jax.lax.rsqrt(ms + EPS) * w


def _softmax(s):
    m = jnp.max(s, axis=-1, keepdims=True)
    e = jnp.exp(s - m)
    return e * pl.reciprocal(jnp.sum(e, axis=-1, keepdims=True), approx=True)


def _new_gelu(x):
    return 0.5 * x * (1.0 + jnp.tanh(GELU_C * (x + 0.044715 * x * x * x)))


def encoder_kernel(src_ref, norm_w_ref, wqkv_ref, bqkv_ref, rel_ref,
                   wp_ref, bp_ref, w1_ref, b1_ref, w2_ref, b2_ref, out_ref):
    src = src_ref[0]            # (T, DP)   padded cols are zero
    norm_w = norm_w_ref[...]    # (1, DP)

    # ---- 1) multi-head self-attention on norm(src) ----------------------------
    x1 = _rmsnorm(src, norm_w)

    # fused QKV projection: one matmul instead of 3*H tiny per-head ones.
    qkv = jnp.dot(x1, wqkv_ref[...],
                  preferred_element_type=jnp.float32) + bqkv_ref[...]   # (T, 3D)
    wp = wp_ref[...]            # (D, DP), cols >= D are zero

    attn = jnp.zeros((T, DP), dtype=jnp.float32)
    for h in range(H):          # H = 4, fully unrolled
        q = qkv[:, h * HS:(h + 1) * HS]                       # (T, HS)
        k = qkv[:, D + h * HS:D + (h + 1) * HS]               # (T, HS)
        v = qkv[:, 2 * D + h * HS:2 * D + (h + 1) * HS]       # (T, HS)

        # scores, reproducing the "/ (1/sqrt(hs))" bug (multiply by sqrt(hs))
        s = jnp.dot(q, k.T, preferred_element_type=jnp.float32) * SQRT_HS

        # relative-position scores on the MXU: batch over t, contract head dim.
        rel_h = rel_ref[h]                                    # (T, T, HS)
        s = s + jnp.einsum('tqc,tvc->tqv', q[:, None, :], rel_h,
                           preferred_element_type=jnp.float32)[:, 0, :]

        att = _softmax(s)                                     # (T, T)
        o = jnp.dot(att, v, preferred_element_type=jnp.float32)   # (T, HS)

        # concat(heads) @ Wproj  ==  sum_h  o_h @ Wproj[h*HS:(h+1)*HS, :]
        attn = attn + jnp.dot(o, wp[h * HS:(h + 1) * HS, :],
                              preferred_element_type=jnp.float32)

    src = src + attn + bp_ref[...]

    # ---- 2) MLP on norm(src) ---------------------------------------------------
    x2 = _rmsnorm(src, norm_w)
    hdn = jnp.dot(x2, w1_ref[...], preferred_element_type=jnp.float32) + b1_ref[...]
    hdn = _new_gelu(hdn)
    mlp = jnp.dot(hdn, w2_ref[...], preferred_element_type=jnp.float32) + b2_ref[...]

    out_ref[0] = src + mlp      # (T, DP) store -> lane-dense, unmasked


# ------------------------------- wrapper ---------------------------------------
def _full_spec(shape):
    n = len(shape)
    return pl.BlockSpec(shape, lambda b, n=n: (0,) * n)


def _prepare_kernel_params(p):
    """Fuse per-head weights and zero-pad the model width D -> DP (=128 lanes)."""
    def fuse_w(w):                              # (H, D, HS) -> (D, H*HS)
        return jnp.transpose(w, (1, 0, 2)).reshape(D, H * HS)

    def fuse_b(b):                              # (H, HS) -> (1, H*HS)
        return b.reshape(1, H * HS)

    wqkv = jnp.concatenate([fuse_w(p["wq"]), fuse_w(p["wk"]), fuse_w(p["wv"])],
                           axis=1)              # (D, 3D)
    bqkv = jnp.concatenate([fuse_b(p["bq"]), fuse_b(p["bk"]), fuse_b(p["bv"])],
                           axis=1)              # (1, 3D)

    wqkv_p = jnp.zeros((DP, 3 * D), jnp.float32).at[:D].set(wqkv)
    norm_w_p = jnp.zeros((1, DP), jnp.float32).at[0, :D].set(p["norm_w"])
    wp_p = jnp.zeros((D, DP), jnp.float32).at[:, :D].set(p["wproj"])
    bp_p = jnp.zeros((1, DP), jnp.float32).at[0, :D].set(p["bproj"])
    w1_p = jnp.zeros((DP, NFF), jnp.float32).at[:D].set(p["w1"])
    b1_p = p["b1"].reshape(1, NFF)
    w2_p = jnp.zeros((NFF, DP), jnp.float32).at[:, :D].set(p["w2"])
    b2_p = jnp.zeros((1, DP), jnp.float32).at[0, :D].set(p["b2"])
    return dict(norm_w=norm_w_p, wqkv=wqkv_p, bqkv=bqkv, rel=p["rel"],
                wp=wp_p, bp=bp_p, w1=w1_p, b1=b1_p, w2=w2_p, b2=b2_p)


def encoder_forward(aud_src, params):
    """aud_src: (B, T, D) float32; params: natural (unfused, unpadded) params."""
    kp = _prepare_kernel_params(params)
    src_p = jnp.zeros((B, T, DP), jnp.float32).at[..., :D].set(aud_src)

    param_list = [kp["norm_w"], kp["wqkv"], kp["bqkv"], kp["rel"],
                  kp["wp"], kp["bp"], kp["w1"], kp["b1"], kp["w2"], kp["b2"]]
    seq_spec = pl.BlockSpec((1, T, DP), lambda b: (b, 0, 0))

    out_p = pl.pallas_call(
        encoder_kernel,
        out_shape=jax.ShapeDtypeStruct((B, T, DP), jnp.float32),
        grid=(B,),
        in_specs=[seq_spec] + [_full_spec(p.shape) for p in param_list],
        out_specs=pl.BlockSpec((1, T, DP), lambda b: (b, 0, 0)),
        compiler_params=pltpu.CompilerParams(
            dimension_semantics=("parallel",)),   # v7x: shard batch over both TCs
    )(src_p, *param_list)
    return out_p[..., :D]


# ------------------------- pure-JAX reference (for checking) -------------------
def encoder_reference(x, p):
    def rms(t):
        return t * jax.lax.rsqrt(jnp.mean(t * t, axis=-1, keepdims=True) + EPS) * p["norm_w"]

    xn = rms(x)
    heads = []
    for h in range(H):
        q = xn @ p["wq"][h] + p["bq"][h]
        k = xn @ p["wk"][h] + p["bk"][h]
        v = xn @ p["wv"][h] + p["bv"][h]
        s = jnp.einsum("btc,bsc->bts", q, k) * SQRT_HS
        s = s + jnp.einsum("btc,tvc->btv", q, p["rel"][h])
        a = jax.nn.softmax(s, axis=-1)
        heads.append(jnp.einsum("bts,bsc->btc", a, v))
    x = x + (jnp.concatenate(heads, axis=-1) @ p["wproj"] + p["bproj"])

    xn = rms(x)
    hdn = xn @ p["w1"] + p["b1"]
    hdn = 0.5 * hdn * (1.0 + jnp.tanh(GELU_C * (hdn + 0.044715 * hdn ** 3)))
    return x + (hdn @ p["w2"] + p["b2"])


# --------------------------------- main -----------------------------------------
if __name__ == "__main__":
    keys = iter(jax.random.split(jax.random.PRNGKey(0), 32))

    def rnd(shape, scale=0.1):
        return jax.random.normal(next(keys), shape, dtype=jnp.float32) * scale

    params = dict(
        norm_w=jnp.ones((D,), jnp.float32),              # RMSNorm init = ones
        wq=rnd((H, D, HS)), bq=rnd((H, HS)),
        wk=rnd((H, D, HS)), bk=rnd((H, HS)),
        wv=rnd((H, D, HS)), bv=rnd((H, HS)),
        rel=rnd((H, T, T, HS), scale=1.0),               # torch.randn init
        wproj=rnd((D, D)), bproj=rnd((D,)),
        w1=rnd((D, NFF)), b1=rnd((NFF,)),
        w2=rnd((NFF, D)), b2=rnd((D,)),
    )
    aud_src = jax.random.normal(next(keys), (B, T, D), dtype=jnp.float32)

    out = jax.block_until_ready(encoder_forward(aud_src, params))
    ref = encoder_reference(aud_src, params)

    # tolerance allows for the EUP approximate reciprocal in the softmax denom
    np.testing.assert_allclose(np.asarray(out), np.asarray(ref), rtol=5e-3, atol=5e-3)

    print("KERNEL_OK")
</pallas_src>

<mosaic_0001>
module attributes {stable_mosaic.version = 11 : i64} {
  func.func @encoder_kernel(%arg0: i32, %arg1: memref<1x8x128xf32, #tpu.memory_space<vmem>>, %arg2: memref<1x128xf32, #tpu.memory_space<vmem>>, %arg3: memref<128x96xf32, #tpu.memory_space<vmem>>, %arg4: memref<1x96xf32, #tpu.memory_space<vmem>>, %arg5: memref<4x8x8x8xf32, #tpu.memory_space<vmem>>, %arg6: memref<32x128xf32, #tpu.memory_space<vmem>>, %arg7: memref<1x128xf32, #tpu.memory_space<vmem>>, %arg8: memref<128x64xf32, #tpu.memory_space<vmem>>, %arg9: memref<1x64xf32, #tpu.memory_space<vmem>>, %arg10: memref<64x128xf32, #tpu.memory_space<vmem>>, %arg11: memref<1x128xf32, #tpu.memory_space<vmem>>, %arg12: memref<1x8x128xf32, #tpu.memory_space<vmem>>) attributes {dimension_semantics = [#tpu.dimension_semantics<parallel>], iteration_bounds = array<i64: 2>, scalar_prefetch = 0 : i64, scratch_operands = 0 : i64, tpu.core_type = #tpu.core_type<tc>, window_params = [{transform_indices = @transform_0, window_bounds = array<i64: 1, 8, 128>}, {pipeline_mode = #tpu.pipeline_mode<synchronous>, transform_indices = @transform_1, window_bounds = array<i64: 1, 128>}, {pipeline_mode = #tpu.pipeline_mode<synchronous>, transform_indices = @transform_2, window_bounds = array<i64: 128, 96>}, {pipeline_mode = #tpu.pipeline_mode<synchronous>, transform_indices = @transform_3, window_bounds = array<i64: 1, 96>}, {pipeline_mode = #tpu.pipeline_mode<synchronous>, transform_indices = @transform_4, window_bounds = array<i64: 4, 8, 8, 8>}, {pipeline_mode = #tpu.pipeline_mode<synchronous>, transform_indices = @transform_5, window_bounds = array<i64: 32, 128>}, {pipeline_mode = #tpu.pipeline_mode<synchronous>, transform_indices = @transform_6, window_bounds = array<i64: 1, 128>}, {pipeline_mode = #tpu.pipeline_mode<synchronous>, transform_indices = @transform_7, window_bounds = array<i64: 128, 64>}, {pipeline_mode = #tpu.pipeline_mode<synchronous>, transform_indices = @transform_8, window_bounds = array<i64: 1, 64>}, {pipeline_mode = #tpu.pipeline_mode<synchronous>, transform_indices = @transform_9, window_bounds = array<i64: 64, 128>}, {pipeline_mode = #tpu.pipeline_mode<synchronous>, transform_indices = @transform_10, window_bounds = array<i64: 1, 128>}, {transform_indices = @transform_11, window_bounds = array<i64: 1, 8, 128>}]} {
    %c0 = arith.constant 0 : index
    %c0_0 = arith.constant 0 : index
    %c0_1 = arith.constant 0 : index
    %0 = vector.load %arg1[%c0, %c0_0, %c0_1] : memref<1x8x128xf32, #tpu.memory_space<vmem>>, vector<1x8x128xf32>
    %1 = vector.shape_cast %0 : vector<1x8x128xf32> to vector<8x128xf32>
    %c0_2 = arith.constant 0 : index
    %c0_3 = arith.constant 0 : index
    %2 = vector.load %arg2[%c0_2, %c0_3] : memref<1x128xf32, #tpu.memory_space<vmem>>, vector<1x128xf32>
    %3 = arith.mulf %1, %1 : vector<8x128xf32>
    %cst = arith.constant dense<0.000000e+00> : vector<8xf32>
    %4 = vector.multi_reduction <add>, %3, %cst [1] : vector<8x128xf32> to vector<8xf32>
    %5 = vector.shape_cast %4 : vector<8xf32> to vector<8x1xf32>
    %cst_4 = arith.constant 3.125000e-02 : f32
    %6 = vector.broadcast %cst_4 : f32 to vector<8x1xf32>
    %7 = arith.mulf %5, %6 : vector<8x1xf32>
    %cst_5 = arith.constant 9.99999997E-7 : f32
    %8 = vector.broadcast %cst_5 : f32 to vector<8x1xf32>
    %9 = arith.addf %7, %8 : vector<8x1xf32>
    %10 = math.rsqrt %9 : vector<8x1xf32>
    %11 = vector.broadcast %10 : vector<8x1xf32> to vector<8x128xf32>
    %12 = arith.mulf %1, %11 : vector<8x128xf32>
    %13 = vector.broadcast %2 : vector<1x128xf32> to vector<8x128xf32>
    %14 = arith.mulf %12, %13 : vector<8x128xf32>
    %c0_6 = arith.constant 0 : index
    %c0_7 = arith.constant 0 : index
    %15 = vector.load %arg3[%c0_6, %c0_7] : memref<128x96xf32, #tpu.memory_space<vmem>>, vector<128x96xf32>
    %cst_8 = arith.constant dense<0.000000e+00> : vector<8x96xf32>
    %16 = tpu.matmul %14, %15, %cst_8 {dimension_numbers = #tpu.dot_dimension_numbers<[1], [0], [0], [1], [0, 0, 1, 1], [], []>} : vector<8x128xf32>, vector<128x96xf32>, vector<8x96xf32> -> vector<8x96xf32>
    %c0_9 = arith.constant 0 : index
    %c0_10 = arith.constant 0 : index
    %17 = vector.load %arg4[%c0_9, %c0_10] : memref<1x96xf32, #tpu.memory_space<vmem>>, vector<1x96xf32>
    %18 = vector.broadcast %17 : vector<1x96xf32> to vector<8x96xf32>
    %19 = arith.addf %16, %18 : vector<8x96xf32>
    %c0_11 = arith.constant 0 : index
    %c0_12 = arith.constant 0 : index
    %20 = vector.load %arg6[%c0_11, %c0_12] : memref<32x128xf32, #tpu.memory_space<vmem>>, vector<32x128xf32>
    %cst_13 = arith.constant 0.000000e+00 : f32
    %21 = vector.broadcast %cst_13 : f32 to vector<8x128xf32>
    %22 = vector.extract_strided_slice %19 {offsets = [0, 0], sizes = [8, 8], strides = [1, 1]} : vector<8x96xf32> to vector<8x8xf32>
    %23 = vector.extract_strided_slice %19 {offsets = [0, 32], sizes = [8, 8], strides = [1, 1]} : vector<8x96xf32> to vector<8x8xf32>
    %24 = vector.extract_strided_slice %19 {offsets = [0, 64], sizes = [8, 8], strides = [1, 1]} : vector<8x96xf32> to vector<8x8xf32>
    %25 = tpu.transpose %23, [1, 0] : vector<8x8xf32> -> vector<8x8xf32>
    %cst_14 = arith.constant dense<0.000000e+00> : vector<8x8xf32>
    %26 = tpu.matmul %22, %25, %cst_14 {dimension_numbers = #tpu.dot_dimension_numbers<[1], [0], [0], [1], [0, 0, 1, 1], [], []>} : vector<8x8xf32>, vector<8x8xf32>, vector<8x8xf32> -> vector<8x8xf32>
    %cst_15 = arith.constant 2.82842708 : f32
    %27 = vector.broadcast %cst_15 : f32 to vector<8x8xf32>
    %28 = arith.mulf %26, %27 : vector<8x8xf32>
    %c0_16 = arith.constant 0 : index
    %c0_17 = arith.constant 0 : index
    %c0_18 = arith.constant 0 : index
    %c0_19 = arith.constant 0 : index
    %29 = vector.load %arg5[%c0_16, %c0_17, %c0_18, %c0_19] : memref<4x8x8x8xf32, #tpu.memory_space<vmem>>, vector<1x8x8x8xf32>
    %30 = vector.shape_cast %29 : vector<1x8x8x8xf32> to vector<8x8x8xf32>
    %31 = vector.shape_cast %22 : vector<8x8xf32> to vector<8x1x8xf32>
    "tpu.trace_start"() <{level = 10 : i32, message = "tqc,tvc->tqv"}> : () -> ()
    %cst_20 = arith.constant dense<0.000000e+00> : vector<8x1x8xf32>
    %32 = tpu.matmul %31, %30, %cst_20 {dimension_numbers = #tpu.dot_dimension_numbers<[2], [2], [1], [1], [0, 0, 0, 1, 1, 1], [0], [0]>} : vector<8x1x8xf32>, vector<8x8x8xf32>, vector<8x1x8xf32> -> vector<8x1x8xf32>
    "tpu.trace_stop"() : () -> ()
    %33 = vector.shape_cast %32 : vector<8x1x8xf32> to vector<8x8xf32>
    %34 = arith.addf %28, %33 : vector<8x8xf32>
    %cst_21 = arith.constant dense<0xFF800000> : vector<8xf32>
    %35 = vector.multi_reduction <maximumf>, %34, %cst_21 [1] : vector<8x8xf32> to vector<8xf32>
    %36 = vector.shape_cast %35 : vector<8xf32> to vector<8x1xf32>
    %37 = vector.broadcast %36 : vector<8x1xf32> to vector<8x8xf32>
    %38 = arith.subf %34, %37 : vector<8x8xf32>
    %39 = math.exp %38 : vector<8x8xf32>
    %cst_22 = arith.constant dense<0.000000e+00> : vector<8xf32>
    %40 = vector.multi_reduction <add>, %39, %cst_22 [1] : vector<8x8xf32> to vector<8xf32>
    %41 = vector.shape_cast %40 : vector<8xf32> to vector<8x1xf32>
    %42 = tpu.reciprocal %41 {approx = true} : vector<8x1xf32> -> vector<8x1xf32>
    %43 = vector.broadcast %42 : vector<8x1xf32> to vector<8x8xf32>
    %44 = arith.mulf %39, %43 : vector<8x8xf32>
    %cst_23 = arith.constant dense<0.000000e+00> : vector<8x8xf32>
    %45 = tpu.matmul %44, %24, %cst_23 {dimension_numbers = #tpu.dot_dimension_numbers<[1], [0], [0], [1], [0, 0, 1, 1], [], []>} : vector<8x8xf32>, vector<8x8xf32>, vector<8x8xf32> -> vector<8x8xf32>
    %46 = vector.extract_strided_slice %20 {offsets = [0, 0], sizes = [8, 128], strides = [1, 1]} : vector<32x128xf32> to vector<8x128xf32>
    %cst_24 = arith.constant dense<0.000000e+00> : vector<8x128xf32>
    %47 = tpu.matmul %45, %46, %cst_24 {dimension_numbers = #tpu.dot_dimension_numbers<[1], [0], [0], [1], [0, 0, 1, 1], [], []>} : vector<8x8xf32>, vector<8x128xf32>, vector<8x128xf32> -> vector<8x128xf32>
    %48 = arith.addf %21, %47 : vector<8x128xf32>
    %49 = vector.extract_strided_slice %19 {offsets = [0, 8], sizes = [8, 8], strides = [1, 1]} : vector<8x96xf32> to vector<8x8xf32>
    %50 = vector.extract_strided_slice %19 {offsets = [0, 40], sizes = [8, 8], strides = [1, 1]} : vector<8x96xf32> to vector<8x8xf32>
    %51 = vector.extract_strided_slice %19 {offsets = [0, 72], sizes = [8, 8], strides = [1, 1]} : vector<8x96xf32> to vector<8x8xf32>
    %52 = tpu.transpose %50, [1, 0] : vector<8x8xf32> -> vector<8x8xf32>
    %cst_25 = arith.constant dense<0.000000e+00> : vector<8x8xf32>
    %53 = tpu.matmul %49, %52, %cst_25 {dimension_numbers = #tpu.dot_dimension_numbers<[1], [0], [0], [1], [0, 0, 1, 1], [], []>} : vector<8x8xf32>, vector<8x8xf32>, vector<8x8xf32> -> vector<8x8xf32>
    %cst_26 = arith.constant 2.82842708 : f32
    %54 = vector.broadcast %cst_26 : f32 to vector<8x8xf32>
    %55 = arith.mulf %53, %54 : vector<8x8xf32>
    %c1 = arith.constant 1 : index
    %c0_27 = arith.constant 0 : index
    %c0_28 = arith.constant 0 : index
    %c0_29 = arith.constant 0 : index
    %56 = vector.load %arg5[%c1, %c0_27, %c0_28, %c0_29] : memref<4x8x8x8xf32, #tpu.memory_space<vmem>>, vector<1x8x8x8xf32>
    %57 = vector.shape_cast %56 : vector<1x8x8x8xf32> to vector<8x8x8xf32>
    %58 = vector.shape_cast %49 : vector<8x8xf32> to vector<8x1x8xf32>
    "tpu.trace_start"() <{level = 10 : i32, message = "tqc,tvc->tqv"}> : () -> ()
    %cst_30 = arith.constant dense<0.000000e+00> : vector<8x1x8xf32>
    %59 = tpu.matmul %58, %57, %cst_30 {dimension_numbers = #tpu.dot_dimension_numbers<[2], [2], [1], [1], [0, 0, 0, 1, 1, 1], [0], [0]>} : vector<8x1x8xf32>, vector<8x8x8xf32>, vector<8x1x8xf32> -> vector<8x1x8xf32>
    "tpu.trace_stop"() : () -> ()
    %60 = vector.shape_cast %59 : vector<8x1x8xf32> to vector<8x8xf32>
    %61 = arith.addf %55, %60 : vector<8x8xf32>
    %cst_31 = arith.constant dense<0xFF800000> : vector<8xf32>
    %62 = vector.multi_reduction <maximumf>, %61, %cst_31 [1] : vector<8x8xf32> to vector<8xf32>
    %63 = vector.shape_cast %62 : vector<8xf32> to vector<8x1xf32>
    %64 = vector.broadcast %63 : vector<8x1xf32> to vector<8x8xf32>
    %65 = arith.subf %61, %64 : vector<8x8xf32>
    %66 = math.exp %65 : vector<8x8xf32>
    %cst_32 = arith.constant dense<0.000000e+00> : vector<8xf32>
    %67 = vector.multi_reduction <add>, %66, %cst_32 [1] : vector<8x8xf32> to vector<8xf32>
    %68 = vector.shape_cast %67 : vector<8xf32> to vector<8x1xf32>
    %69 = tpu.reciprocal %68 {approx = true} : vector<8x1xf32> -> vector<8x1xf32>
    %70 = vector.broadcast %69 : vector<8x1xf32> to vector<8x8xf32>
    %71 = arith.mulf %66, %70 : vector<8x8xf32>
    %cst_33 = arith.constant dense<0.000000e+00> : vector<8x8xf32>
    %72 = tpu.matmul %71, %51, %cst_33 {dimension_numbers = #tpu.dot_dimension_numbers<[1], [0], [0], [1], [0, 0, 1, 1], [], []>} : vector<8x8xf32>, vector<8x8xf32>, vector<8x8xf32> -> vector<8x8xf32>
    %73 = vector.extract_strided_slice %20 {offsets = [8, 0], sizes = [8, 128], strides = [1, 1]} : vector<32x128xf32> to vector<8x128xf32>
    %cst_34 = arith.constant dense<0.000000e+00> : vector<8x128xf32>
    %74 = tpu.matmul %72, %73, %cst_34 {dimension_numbers = #tpu.dot_dimension_numbers<[1], [0], [0], [1], [0, 0, 1, 1], [], []>} : vector<8x8xf32>, vector<8x128xf32>, vector<8x128xf32> -> vector<8x128xf32>
    %75 = arith.addf %48, %74 : vector<8x128xf32>
    %76 = vector.extract_strided_slice %19 {offsets = [0, 16], sizes = [8, 8], strides = [1, 1]} : vector<8x96xf32> to vector<8x8xf32>
    %77 = vector.extract_strided_slice %19 {offsets = [0, 48], sizes = [8, 8], strides = [1, 1]} : vector<8x96xf32> to vector<8x8xf32>
    %78 = vector.extract_strided_slice %19 {offsets = [0, 80], sizes = [8, 8], strides = [1, 1]} : vector<8x96xf32> to vector<8x8xf32>
    %79 = tpu.transpose %77, [1, 0] : vector<8x8xf32> -> vector<8x8xf32>
    %cst_35 = arith.constant dense<0.000000e+00> : vector<8x8xf32>
    %80 = tpu.matmul %76, %79, %cst_35 {dimension_numbers = #tpu.dot_dimension_numbers<[1], [0], [0], [1], [0, 0, 1, 1], [], []>} : vector<8x8xf32>, vector<8x8xf32>, vector<8x8xf32> -> vector<8x8xf32>
    %cst_36 = arith.constant 2.82842708 : f32
    %81 = vector.broadcast %cst_36 : f32 to vector<8x8xf32>
    %82 = arith.mulf %80, %81 : vector<8x8xf32>
    %c2 = arith.constant 2 : index
    %c0_37 = arith.constant 0 : index
    %c0_38 = arith.constant 0 : index
    %c0_39 = arith.constant 0 : index
    %83 = vector.load %arg5[%c2, %c0_37, %c0_38, %c0_39] : memref<4x8x8x8xf32, #tpu.memory_space<vmem>>, vector<1x8x8x8xf32>
    %84 = vector.shape_cast %83 : vector<1x8x8x8xf32> to vector<8x8x8xf32>
    %85 = vector.shape_cast %76 : vector<8x8xf32> to vector<8x1x8xf32>
    "tpu.trace_start"() <{level = 10 : i32, message = "tqc,tvc->tqv"}> : () -> ()
    %cst_40 = arith.constant dense<0.000000e+00> : vector<8x1x8xf32>
    %86 = tpu.matmul %85, %84, %cst_40 {dimension_numbers = #tpu.dot_dimension_numbers<[2], [2], [1], [1], [0, 0, 0, 1, 1, 1], [0], [0]>} : vector<8x1x8xf32>, vector<8x8x8xf32>, vector<8x1x8xf32> -> vector<8x1x8xf32>
    "tpu.trace_stop"() : () -> ()
    %87 = vector.shape_cast %86 : vector<8x1x8xf32> to vector<8x8xf32>
    %88 = arith.addf %82, %87 : vector<8x8xf32>
    %cst_41 = arith.constant dense<0xFF800000> : vector<8xf32>
    %89 = vector.multi_reduction <maximumf>, %88, %cst_41 [1] : vector<8x8xf32> to vector<8xf32>
    %90 = vector.shape_cast %89 : vector<8xf32> to vector<8x1xf32>
    %91 = vector.broadcast %90 : vector<8x1xf32> to vector<8x8xf32>
    %92 = arith.subf %88, %91 : vector<8x8xf32>
    %93 = math.exp %92 : vector<8x8xf32>
    %cst_42 = arith.constant dense<0.000000e+00> : vector<8xf32>
    %94 = vector.multi_reduction <add>, %93, %cst_42 [1] : vector<8x8xf32> to vector<8xf32>
    %95 = vector.shape_cast %94 : vector<8xf32> to vector<8x1xf32>
    %96 = tpu.reciprocal %95 {approx = true} : vector<8x1xf32> -> vector<8x1xf32>
    %97 = vector.broadcast %96 : vector<8x1xf32> to vector<8x8xf32>
    %98 = arith.mulf %93, %97 : vector<8x8xf32>
    %cst_43 = arith.constant dense<0.000000e+00> : vector<8x8xf32>
    %99 = tpu.matmul %98, %78, %cst_43 {dimension_numbers = #tpu.dot_dimension_numbers<[1], [0], [0], [1], [0, 0, 1, 1], [], []>} : vector<8x8xf32>, vector<8x8xf32>, vector<8x8xf32> -> vector<8x8xf32>
    %100 = vector.extract_strided_slice %20 {offsets = [16, 0], sizes = [8, 128], strides = [1, 1]} : vector<32x128xf32> to vector<8x128xf32>
    %cst_44 = arith.constant dense<0.000000e+00> : vector<8x128xf32>
    %101 = tpu.matmul %99, %100, %cst_44 {dimension_numbers = #tpu.dot_dimension_numbers<[1], [0], [0], [1], [0, 0, 1, 1], [], []>} : vector<8x8xf32>, vector<8x128xf32>, vector<8x128xf32> -> vector<8x128xf32>
    %102 = arith.addf %75, %101 : vector<8x128xf32>
    %103 = vector.extract_strided_slice %19 {offsets = [0, 24], sizes = [8, 8], strides = [1, 1]} : vector<8x96xf32> to vector<8x8xf32>
    %104 = vector.extract_strided_slice %19 {offsets = [0, 56], sizes = [8, 8], strides = [1, 1]} : vector<8x96xf32> to vector<8x8xf32>
    %105 = vector.extract_strided_slice %19 {offsets = [0, 88], sizes = [8, 8], strides = [1, 1]} : vector<8x96xf32> to vector<8x8xf32>
    %106 = tpu.transpose %104, [1, 0] : vector<8x8xf32> -> vector<8x8xf32>
    %cst_45 = arith.constant dense<0.000000e+00> : vector<8x8xf32>
    %107 = tpu.matmul %103, %106, %cst_45 {dimension_numbers = #tpu.dot_dimension_numbers<[1], [0], [0], [1], [0, 0, 1, 1], [], []>} : vector<8x8xf32>, vector<8x8xf32>, vector<8x8xf32> -> vector<8x8xf32>
    %cst_46 = arith.constant 2.82842708 : f32
    %108 = vector.broadcast %cst_46 : f32 to vector<8x8xf32>
    %109 = arith.mulf %107, %108 : vector<8x8xf32>
    %c3 = arith.constant 3 : index
    %c0_47 = arith.constant 0 : index
    %c0_48 = arith.constant 0 : index
    %c0_49 = arith.constant 0 : index
    %110 = vector.load %arg5[%c3, %c0_47, %c0_48, %c0_49] : memref<4x8x8x8xf32, #tpu.memory_space<vmem>>, vector<1x8x8x8xf32>
    %111 = vector.shape_cast %110 : vector<1x8x8x8xf32> to vector<8x8x8xf32>
    %112 = vector.shape_cast %103 : vector<8x8xf32> to vector<8x1x8xf32>
    "tpu.trace_start"() <{level = 10 : i32, message = "tqc,tvc->tqv"}> : () -> ()
    %cst_50 = arith.constant dense<0.000000e+00> : vector<8x1x8xf32>
    %113 = tpu.matmul %112, %111, %cst_50 {dimension_numbers = #tpu.dot_dimension_numbers<[2], [2], [1], [1], [0, 0, 0, 1, 1, 1], [0], [0]>} : vector<8x1x8xf32>, vector<8x8x8xf32>, vector<8x1x8xf32> -> vector<8x1x8xf32>
    "tpu.trace_stop"() : () -> ()
    %114 = vector.shape_cast %113 : vector<8x1x8xf32> to vector<8x8xf32>
    %115 = arith.addf %109, %114 : vector<8x8xf32>
    %cst_51 = arith.constant dense<0xFF800000> : vector<8xf32>
    %116 = vector.multi_reduction <maximumf>, %115, %cst_51 [1] : vector<8x8xf32> to vector<8xf32>
    %117 = vector.shape_cast %116 : vector<8xf32> to vector<8x1xf32>
    %118 = vector.broadcast %117 : vector<8x1xf32> to vector<8x8xf32>
    %119 = arith.subf %115, %118 : vector<8x8xf32>
    %120 = math.exp %119 : vector<8x8xf32>
    %cst_52 = arith.constant dense<0.000000e+00> : vector<8xf32>
    %121 = vector.multi_reduction <add>, %120, %cst_52 [1] : vector<8x8xf32> to vector<8xf32>
    %122 = vector.shape_cast %121 : vector<8xf32> to vector<8x1xf32>
    %123 = tpu.reciprocal %122 {approx = true} : vector<8x1xf32> -> vector<8x1xf32>
    %124 = vector.broadcast %123 : vector<8x1xf32> to vector<8x8xf32>
    %125 = arith.mulf %120, %124 : vector<8x8xf32>
    %cst_53 = arith.constant dense<0.000000e+00> : vector<8x8xf32>
    %126 = tpu.matmul %125, %105, %cst_53 {dimension_numbers = #tpu.dot_dimension_numbers<[1], [0], [0], [1], [0, 0, 1, 1], [], []>} : vector<8x8xf32>, vector<8x8xf32>, vector<8x8xf32> -> vector<8x8xf32>
    %127 = vector.extract_strided_slice %20 {offsets = [24, 0], sizes = [8, 128], strides = [1, 1]} : vector<32x128xf32> to vector<8x128xf32>
    %cst_54 = arith.constant dense<0.000000e+00> : vector<8x128xf32>
    %128 = tpu.matmul %126, %127, %cst_54 {dimension_numbers = #tpu.dot_dimension_numbers<[1], [0], [0], [1], [0, 0, 1, 1], [], []>} : vector<8x8xf32>, vector<8x128xf32>, vector<8x128xf32> -> vector<8x128xf32>
    %129 = arith.addf %102, %128 : vector<8x128xf32>
    %130 = arith.addf %1, %129 : vector<8x128xf32>
    %c0_55 = arith.constant 0 : index
    %c0_56 = arith.constant 0 : index
    %131 = vector.load %arg7[%c0_55, %c0_56] : memref<1x128xf32, #tpu.memory_space<vmem>>, vector<1x128xf32>
    %132 = vector.broadcast %131 : vector<1x128xf32> to vector<8x128xf32>
    %133 = arith.addf %130, %132 : vector<8x128xf32>
    %134 = arith.mulf %133, %133 : vector<8x128xf32>
    %cst_57 = arith.constant dense<0.000000e+00> : vector<8xf32>
    %135 = vector.multi_reduction <add>, %134, %cst_57 [1] : vector<8x128xf32> to vector<8xf32>
    %136 = vector.shape_cast %135 : vector<8xf32> to vector<8x1xf32>
    %cst_58 = arith.constant 3.125000e-02 : f32
    %137 = vector.broadcast %cst_58 : f32 to vector<8x1xf32>
    %138 = arith.mulf %136, %137 : vector<8x1xf32>
    %cst_59 = arith.constant 9.99999997E-7 : f32
    %139 = vector.broadcast %cst_59 : f32 to vector<8x1xf32>
    %140 = arith.addf %138, %139 : vector<8x1xf32>
    %141 = math.rsqrt %140 : vector<8x1xf32>
    %142 = vector.broadcast %141 : vector<8x1xf32> to vector<8x128xf32>
    %143 = arith.mulf %133, %142 : vector<8x128xf32>
    %144 = vector.broadcast %2 : vector<1x128xf32> to vector<8x128xf32>
    %145 = arith.mulf %143, %144 : vector<8x128xf32>
    %c0_60 = arith.constant 0 : index
    %c0_61 = arith.constant 0 : index
    %146 = vector.load %arg8[%c0_60, %c0_61] : memref<128x64xf32, #tpu.memory_space<vmem>>, vector<128x64xf32>
    %cst_62 = arith.constant dense<0.000000e+00> : vector<8x64xf32>
    %147 = tpu.matmul %145, %146, %cst_62 {dimension_numbers = #tpu.dot_dimension_numbers<[1], [0], [0], [1], [0, 0, 1, 1], [], []>} : vector<8x128xf32>, vector<128x64xf32>, vector<8x64xf32> -> vector<8x64xf32>
    %c0_63 = arith.constant 0 : index
    %c0_64 = arith.constant 0 : index
    %148 = vector.load %arg9[%c0_63, %c0_64] : memref<1x64xf32, #tpu.memory_space<vmem>>, vector<1x64xf32>
    %149 = vector.broadcast %148 : vector<1x64xf32> to vector<8x64xf32>
    %150 = arith.addf %147, %149 : vector<8x64xf32>
    %cst_65 = arith.constant 5.000000e-01 : f32
    %151 = vector.broadcast %cst_65 : f32 to vector<8x64xf32>
    %152 = arith.mulf %151, %150 : vector<8x64xf32>
    %cst_66 = arith.constant 4.471500e-02 : f32
    %153 = vector.broadcast %cst_66 : f32 to vector<8x64xf32>
    %154 = arith.mulf %153, %150 : vector<8x64xf32>
    %155 = arith.mulf %154, %150 : vector<8x64xf32>
    %156 = arith.mulf %155, %150 : vector<8x64xf32>
    %157 = arith.addf %150, %156 : vector<8x64xf32>
    %cst_67 = arith.constant 0.797884583 : f32
    %158 = vector.broadcast %cst_67 : f32 to vector<8x64xf32>
    %159 = arith.mulf %158, %157 : vector<8x64xf32>
    %160 = math.tanh %159 : vector<8x64xf32>
    %cst_68 = arith.constant 1.000000e+00 : f32
    %161 = vector.broadcast %cst_68 : f32 to vector<8x64xf32>
    %162 = arith.addf %161, %160 : vector<8x64xf32>
    %163 = arith.mulf %152, %162 : vector<8x64xf32>
    %c0_69 = arith.constant 0 : index
    %c0_70 = arith.constant 0 : index
    %164 = vector.load %arg10[%c0_69, %c0_70] : memref<64x128xf32, #tpu.memory_space<vmem>>, vector<64x128xf32>
    %cst_71 = arith.constant dense<0.000000e+00> : vector<8x128xf32>
    %165 = tpu.matmul %163, %164, %cst_71 {dimension_numbers = #tpu.dot_dimension_numbers<[1], [0], [0], [1], [0, 0, 1, 1], [], []>} : vector<8x64xf32>, vector<64x128xf32>, vector<8x128xf32> -> vector<8x128xf32>
    %c0_72 = arith.constant 0 : index
    %c0_73 = arith.constant 0 : index
    %166 = vector.load %arg11[%c0_72, %c0_73] : memref<1x128xf32, #tpu.memory_space<vmem>>, vector<1x128xf32>
    %167 = vector.broadcast %166 : vector<1x128xf32> to vector<8x128xf32>
    %168 = arith.addf %165, %167 : vector<8x128xf32>
    %169 = arith.addf %133, %168 : vector<8x128xf32>
    %c0_74 = arith.constant 0 : index
    %c0_75 = arith.constant 0 : index
    %c0_76 = arith.constant 0 : index
    %170 = vector.load %arg12[%c0_74, %c0_75, %c0_76] : memref<1x8x128xf32, #tpu.memory_space<vmem>>, vector<1x8x128xf32>
    %171 = vector.shape_cast %170 : vector<1x8x128xf32> to vector<8x128xf32>
    %172 = vector.shape_cast %169 : vector<8x128xf32> to vector<1x8x128xf32>
    tpu.vector_store %arg12[%c0_74, %c0_75, %c0_76], %172 {strides = array<i32>} : memref<1x8x128xf32, #tpu.memory_space<vmem>>, vector<1x8x128xf32>,
    return
  }
  func.func @transform_0(%arg0: i32) -> (i32, i32, i32) {
    %c0_i32 = arith.constant 0 : i32
    %c0_i32_0 = arith.constant 0 : i32
    %c0_i32_1 = arith.constant 0 : i32
    return %arg0, %c0_i32, %c0_i32_0 : i32, i32, i32
  }
  func.func @transform_1(%arg0: i32) -> (i32, i32) {
    %c0_i32 = arith.constant 0 : i32
    %c0_i32_0 = arith.constant 0 : i32
    %c0_i32_1 = arith.constant 0 : i32
    return %c0_i32, %c0_i32_0 : i32, i32
  }
  func.func @transform_2(%arg0: i32) -> (i32, i32) {
    %c0_i32 = arith.constant 0 : i32
    %c0_i32_0 = arith.constant 0 : i32
    %c0_i32_1 = arith.constant 0 : i32
    return %c0_i32, %c0_i32_0 : i32, i32
  }
  func.func @transform_3(%arg0: i32) -> (i32, i32) {
    %c0_i32 = arith.constant 0 : i32
    %c0_i32_0 = arith.constant 0 : i32
    %c0_i32_1 = arith.constant 0 : i32
    return %c0_i32, %c0_i32_0 : i32, i32
  }
  func.func @transform_4(%arg0: i32) -> (i32, i32, i32, i32) {
    %c0_i32 = arith.constant 0 : i32
    %c0_i32_0 = arith.constant 0 : i32
    %c0_i32_1 = arith.constant 0 : i32
    %c0_i32_2 = arith.constant 0 : i32
    %c0_i32_3 = arith.constant 0 : i32
    return %c0_i32, %c0_i32_0, %c0_i32_1, %c0_i32_2 : i32, i32, i32, i32
  }
  func.func @transform_5(%arg0: i32) -> (i32, i32) {
    %c0_i32 = arith.constant 0 : i32
    %c0_i32_0 = arith.constant 0 : i32
    %c0_i32_1 = arith.constant 0 : i32
    return %c0_i32, %c0_i32_0 : i32, i32
  }
  func.func @transform_6(%arg0: i32) -> (i32, i32) {
    %c0_i32 = arith.constant 0 : i32
    %c0_i32_0 = arith.constant 0 : i32
    %c0_i32_1 = arith.constant 0 : i32
    return %c0_i32, %c0_i32_0 : i32, i32
  }
  func.func @transform_7(%arg0: i32) -> (i32, i32) {
    %c0_i32 = arith.constant 0 : i32
    %c0_i32_0 = arith.constant 0 : i32
    %c0_i32_1 = arith.constant 0 : i32
    return %c0_i32, %c0_i32_0 : i32, i32
  }
  func.func @transform_8(%arg0: i32) -> (i32, i32) {
    %c0_i32 = arith.constant 0 : i32
    %c0_i32_0 = arith.constant 0 : i32
    %c0_i32_1 = arith.constant 0 : i32
    return %c0_i32, %c0_i32_0 : i32, i32
  }
  func.func @transform_9(%arg0: i32) -> (i32, i32) {
    %c0_i32 = arith.constant 0 : i32
    %c0_i32_0 = arith.constant 0 : i32
    %c0_i32_1 = arith.constant 0 : i32
    return %c0_i32, %c0_i32_0 : i32, i32
  }
  func.func @transform_10(%arg0: i32) -> (i32, i32) {
    %c0_i32 = arith.constant 0 : i32
    %c0_i32_0 = arith.constant 0 : i32
    %c0_i32_1 = arith.constant 0 : i32
    return %c0_i32, %c0_i32_0 : i32, i32
  }
  func.func @transform_11(%arg0: i32) -> (i32, i32, i32) {
    %c0_i32 = arith.constant 0 : i32
    %c0_i32_0 = arith.constant 0 : i32
    %c0_i32_1 = arith.constant 0 : i32
    return %arg0, %c0_i32, %c0_i32_0 : i32, i32, i32
  }
}

</mosaic_0001>

<bundles_post_ra>
// kernel: tpu_custom_call.1
= control target key start
LH: loop header
LB: loop body
LE: loop exit
PB: predicated region body
PF: predicated region fallthrough
CT: control target
= control target key end

     0   :  { %16 = vsyncpa [#allocation3], 0  ;;  %s6078_s0 = inlined_call_operand.hbm [shape: f32[2,8,128], index: 0, kind: input, shape index: {}]   ;;  %s6079_s1 = inlined_call_operand.vmem [shape: f32[1,128], index: 1, kind: input, shape index: {}]   ;;  %s6080_s2 = inlined_call_operand.vmem [shape: f32[128,96], index: 2, kind: input, shape index: {}]   ;;  %s6081_s3 = inlined_call_operand.vmem [shape: f32[1,96], index: 3, kind: input, shape index: {}]   ;;  %s6082_s4 = inlined_call_operand.vmem [shape: f32[4,8,8,8], index: 4, kind: input, shape index: {}]   ;;  %s6083_s5 = inlined_call_operand.vmem [shape: f32[32,128], index: 5, kind: input, shape index: {}]   ;;  %s6084_s6 = inlined_call_operand.vmem [shape: f32[1,128], index: 6, kind: input, shape index: {}]   ;;  %s6085_s7 = inlined_call_operand.vmem [shape: f32[128,64], index: 7, kind: input, shape index: {}]   ;;  %s6086_s8 = inlined_call_operand.vmem [shape: f32[1,64], index: 8, kind: input, shape index: {}]   ;;  %s6087_s9 = inlined_call_operand.vmem [shape: f32[64,128], index: 9, kind: input, shape index: {}]   ;;  %s6088_s10 = inlined_call_operand.vmem [shape: f32[1,128], index: 10, kind: input, shape index: {}]   ;;  %s6089_s11 = inlined_call_operand.hbm [shape: f32[2,8,128], index: 11, kind: output, shape index: {}]  }
   0x1   :  { %18 = vsyncpa [#allocation3 + $0x1], 0 }
   0x2   :  { %19 = vsyncpa [#allocation4], 0 }
   0x3   :  { %21 = vsyncpa [#allocation4 + $0x1], 0  ;;  %s5250_s17 = smov 0   ;;  %s5252_s18 = smov 0  }
   0x4   :  { %s5254_s19 = smov 0   ;;  %s5256_s20 = smov 0  }
   0x5 LB: > { %6096 = sst [smem:[#allocation8_spill]] %s5168_s19  ;;  %s5271_s21 = sadd.s32 4294967295, %s5172_s20   ;;  %s5172_s20 = sphi %s5256_s20, %s6112_s20   ;;  %s5168_s19 = sphi %s5254_s19, %s6114_s19   ;;  %s5164_s18 = sphi %s5252_s18, %s6116_s18   ;;  %s5160_s17 = sphi %s5250_s17, %s6115_s17  }
   0x6   : > { %s4434_s22 = sadd.s32 4294967294, %s5172_s20   ;;  %s5275_s23 = sadd.s32 1, %s5172_s20  }
   0x7   : > { %6097 = sst [smem:[#allocation9_spill]] %s5275_s23  ;;  %s34_s24 = sadd.s32 1, %s5168_s19 }
   0x8   : > { %s31_s25 = ssub.s32 %s5172_s20, %s5275_s23  ;;  %p41_p0 = scmp.ne.s32.totalorder %s5168_s19, %s5164_s18 }
   0x9   : > { %p32_p1 = scmp.eq.s32.totalorder %s31_s25, 0  ;;  %p42_p2 = scmp.eq.s32.totalorder %s5172_s20, 0 }
   0xa   : > { %p47_p3 = scmp.ne.s32.totalorder %s5164_s18, %s5160_s17  ;;  %p48_p4 = scmp.eq.s32.totalorder %s5271_s21, 0 }
   0xb   : > { %s5287_s26 = scalar_select %p32_p1, %s5168_s19, %s34_s24  }
   0xc   : > { %p5289_p5 = por %p42_p2, %p41_p0  ;;  %p5293_p6 = por %p48_p4, %p47_p3 }
   0xd   : > { %6098 = sst [smem:[#allocation10_spill]] %s5287_s26  ;;  %p281_p7 = scmp.eq.s32.totalorder %s5271_s21, 1 }
   0xe   : > { %s6100_s28 = scalar_select %p5293_p6, 1, 0 }
   0xf   : > { %p287_p8 = scmp.eq.s32.totalorder %s4434_s22, 1  ;;  %p5008_p10 = scmp.lt.s32.totalorder %s5172_s20, 2 }
  0x10   : > { %p5300_p11 = por %p281_p7, %p41_p0  ;;  %s337_s12 = sand.u32 1, %s5168_s19  }
  0x11   : > { %p5304_p12 = por %p287_p8, %p47_p3  ;;  %s4438_s13 = sshll.u32 %s5172_s20, 7 }
  0x12   : > { %s6101_s29 = scalar_select %p5300_p11, 1, 0 }
  0x13   : > { %s6102_s30 = scalar_select %p5304_p12, 1, 0 }
  0x14   : > { %s4437_s14 = sshll.u32 %s337_s12, 3  ;;  %s5313_s24 = scalar_lea.hbm %s6078_s0, %s4438_s13 }
  0x15   : > { %6103 = sst [smem:[#allocation11_spill]] %s6102_s30  ;;  %s341_s22 = scalar_lea.vmem [#allocation2], %s4437_s14 }
  0x16   : > { %s348_s25 = sshll.u32 %s341_s22, 4  ;;  %p5317_p13 = pnand %p5008_p10, %p5289_p5  ;;  %s5321_s25 = int_to_ptr.vmem [resolvable:$true] %s348_s25 }
  0x17   : > { %s338_s19 = scalar_lea.sflag [#allocation3], %s337_s12  ;;  %s5080_s23 = scalar_lea.hbm %s5313_s24, 128 }
  0x18   : > { %p5081_p2 = scmp.ne.s32.totalorder %s5313_s24, %s5080_s23  ;;  %p5082_p3 = pneg %p5317_p13 }
  0x19   : > { %s5085_s27 = scalar_lea.hbm %s6078_s0, 256  ;;  %p5086_p5 = scmp.lt.s32.totalorder %s5313_s24, %s6078_s0 }
  0x1a   : > { %p5083_p4 = pnand %p5082_p3, %p5081_p2  ;;  %p5087_p8 = scmp.lt.s32.totalorder %s5085_s27, %s5080_s23 }
  0x1c   : > { %p5084_p7 = pneg %p5083_p4  ;;  %p5088_p10 = por %p5087_p8, %p5086_p5 }
  0x1e   : > { %p5089_p9 = pnand %p5088_p10, %p5084_p7 }
  0x20   : > { %5092 = shalt.err (!%p5089_p9)
}
  0x21   : > { %s5093_s12 = scalar_lea.vmem %s5321_s25, 128  ;;  %s5174_s22 = smov [#allocation2]  }
  0x22   : > { %p5094_p0 = scmp.ne.s32.totalorder %s5321_s25, %s5093_s12  ;;  %s5098_s30 = sshll.u32 %s5174_s22, 4  ;;  %s5099_s30 = int_to_ptr.vmem [resolvable:$false] %s5098_s30 }
  0x23   : > { %s5100_s13 = scalar_lea.vmem %s5099_s30, 256  ;;  %p5101_p4 = scmp.lt.s32.totalorder %s5321_s25, %s5099_s30 }
  0x24   : > { %p5096_p1 = pnand %p5094_p0, %p5082_p3  ;;  %p5102_p12 = scmp.lt.s32.totalorder %s5100_s13, %s5093_s12 }
  0x26   : > { %p5097_p2 = pneg %p5096_p1  ;;  %p5103_p11 = por %p5102_p12, %p5101_p4 }
  0x28   : > { %p5104_p6 = pnand %p5103_p11, %p5097_p2 }
  0x2a   : > { %5107 = shalt.err (!%p5104_p6)
}
  0x2b   : > { %5003 = dma.hbm_to_vmem [thread:$0]  (!%p5317_p13), %s5313_s24, 128, %s5321_s25, %s338_s19  }
  0x2c   : > { %p6105_p9 = scmp.lt.s32.totalorder %s5172_s20, 3  ;;  %p6106_p7 = scmp.ge.s32.totalorder %s5172_s20, 1 }
  0x2e   : > { %p354_p0 = pnand %p6106_p7, %p6105_p9 }
  0x2f   : > { %s5348_s23 = sand.u32 (!%p354_p0), 1, %s5164_s18   ;;  %p6107_p6 = scmp.ne.s32.totalorder (!%p354_p0), %s6100_s28, 0 }
  0x30   : > { %357 = sbr.rel (%p354_p0) target bundleno = 4033 (0xfc1), region = 64  ;;  %s4440_s30 = sshll.u32 (!%p354_p0), %s5348_s23, 3 }
  0x31   : > { %s360_s14 = scalar_lea.sflag (!%p354_p0), [#allocation3], %s5348_s23  ;;  %s5354_s26 = scalar_lea.vmem (!%p354_p0), [#allocation2], %s4440_s30 }
  0x35   : > { %5151 = dma.done.wait (%p6107_p6), %s360_s14, 128  }
  0x36   : > { %5153 = vsyncadd (%p6107_p6), %s360_s14, 4294967168  ;;  %v5175_v0 = vmov 0.0   ;;  %v402_v1 = vld [vmem:[%s5354_s26] sm:$0xff]  ;;  %v433_v2 = vld [vmem:[%s6080_s2 + $0x78] sm:$0xff]  ;;  %vm5176_vm0 = vmmov 0   ;;  %v606_v28 = vlaneseq  ;;  %vm518_vm1 = vcmask 64512  }
  0x37   : > { %4687 = vmatprep.subr.mxu0 %v5175_v0  ;;  %4722 = vmatprep.subr.mxu1 %v5175_v0  ;;  %v432_v3 = vld [vmem:[%s6080_s2 + $0x70] sm:$0xff]  ;;  %v404_v4 = vmul.f32 %v402_v1, %v402_v1  ;;  %v431_v5 = vld [vmem:[%s6080_s2 + $0x68] sm:$0xff]  ;;  %v430_v6 = vld [vmem:[%s6080_s2 + $0x60] sm:$0xff]  ;;  %v5177_v26 = vmov 1966171168   ;;  %s5178_s15 = smov 96  }
  0x38   : > { %4688 = vmatpush3.msra.mxu0 %v433_v2  ;;  %v429_v7 = vld [vmem:[%s6080_s2 + $0x58] sm:$0xff]  ;;  %v428_v8 = vld [vmem:[%s6080_s2 + $0x50] sm:$0xff]  ;;  %v427_v9 = vld [vmem:[%s6080_s2 + $0x48] sm:$0xff]  ;;  %4719 = vmatprep.mubr.msk.f32.mxu0 %vm5176_vm0, %v5175_v0  ;;  %v604_v27 = vunpack.c.l.s4 %v5177_v26  ;;  %v607_v31 = vshrl.u32 %v606_v28, 7  ;;  %s5179_s16 = smov 120   ;;  %vm1260_vm2 = vcmask 1041409  }
  0x39   : > { %4689 = vmatprep.subr.mxu0 %v5175_v0  ;;  %405 = vadd.xlane.f32.xlu0 %v404_v4  ;;  %v426_v10 = vld [vmem:[%s6080_s2 + $0x40] sm:$0xff]  ;;  %v425_v11 = vld [vmem:[%s6080_s2 + $0x38] sm:$0xff]  ;;  %v424_v12 = vld [vmem:[%s6080_s2 + $0x30] sm:$0xff]  ;;  %vm1263_vm3 = vcmask 1042434   ;;  %vm1266_vm4 = vcmask 1043459   ;;  %vm1269_vm5 = vcmask 1044484  }
  0x3a   : > { %4690 = vmatpush3.msra.mxu0 %v432_v3  ;;  %4724 = vmatprep.mubr.msk.f32.mxu1 %vm5176_vm0, %v5175_v0  ;;  %v423_v13 = vld [vmem:[%s6080_s2 + $0x28] sm:$0xff]  ;;  %v422_v14 = vld [vmem:[%s6080_s2 + $0x20] sm:$0xff]  ;;  %v421_v15 = vld [vmem:[%s6080_s2 + $0x18] sm:$0xff]  ;;  %v605_v30 = vunpack.c.0.s8 %v604_v27  ;;  %v5454_v43 = vsub.s32 0, %v607_v31  ;;  %vm1272_vm6 = vcmask 1045509   ;;  %vm1275_vm7 = vcmask 1046534  }
  0x3b   : > { %4691 = vmatprep.subr.mxu0 %v5175_v0  ;;  %v420_v16 = vld [vmem:[%s6080_s2 + $0x10] sm:$0xff]  ;;  %v419_v17 = vld [vmem:[%s6080_s2 + $0x8] sm:$0xff]  ;;  %v418_v18 = vld [vmem:[%s6080_s2] sm:$0xff]  ;;  %vm1278_vm8 = vcmask 1047559   ;;  %s5180_s13 = smov 64   ;;  %s5181_s14 = smov 88  }
  0x3c   : > { %4692 = vmatpush3.msra.mxu0 %v431_v5  ;;  %v4442_v23 = vld [vmem:[%s6079_s1] ss:$0 sm:$0xff]  ;;  %v4466_v29 = vld [vmem:[%s6082_s4 + $0x48] sm:$0xff]  ;;  %v608_v33 = vsub.s32 %v605_v30, %v607_v31  ;;  %v4468_v57 = vld [vmem:[%s6082_s4 + $0x58] sm:$0xff]  ;;  %s5182_s22 = smov 80   ;;  %s5187_s19 = smov 72  }
  0x3d   : > { %4693 = vmatprep.subr.mxu0 %v5175_v0  ;;  %v4443_v32 = vld [vmem:[%s6081_s3] ss:$0 sm:$0xff]  ;;  %v595_v56 = vld [vmem:[%s6082_s4 + $0x8] sm:$0xff]  ;;  %v596_v59 = vld [vmem:[%s6082_s4 + $0x10] sm:$0xff]  ;;  %vm4274_vm9 = vcmask 523264   ;;  %s4351_s25 = scalar_lea.sflag [#allocation4], %s5348_s23 }
  0x3e   : > { %4694 = vmatpush3.msra.mxu0 %v430_v6  ;;  %v594_v54 = vld [vmem:[%s6082_s4] sm:$0xff]  ;;  %v4470_v60 = vld [vmem:[%s6082_s4 + $0x68] sm:$0xff]  ;;  %v597_v63 = vld [vmem:[%s6082_s4 + $0x18] sm:$0xff]  ;;  %p6108_p12 = scmp.ne.s32.totalorder %s6101_s29, 0 }
  0x3f   : > { %4695 = vmatprep.subr.mxu0 %v5175_v0  ;;  %v598_v3 = vld [vmem:[%s6082_s4 + $0x20] sm:$0xff]  ;;  %v599_v5 = vld [vmem:[%s6082_s4 + $0x28] sm:$0xff]  ;;  %v600_v6 = vld [vmem:[%s6082_s4 + $0x30] sm:$0xff] }
  0x40   : > { %4696 = vmatpush3.msra.mxu0 %v429_v7 }
  0x41   : > { %4697 = vmatprep.subr.mxu0 %v5175_v0 }
  0x42   : > { %4698 = vmatpush3.msra.mxu0 %v428_v8  ;;  %v601_v8 = vld [vmem:[%s6082_s4 + $0x38] sm:$0xff] }
  0x43   : > { %4699 = vmatprep.subr.mxu0 %v5175_v0 }
  0x44   : > { %4700 = vmatpush3.msra.mxu0 %v427_v9 }
  0x45   : > { %4701 = vmatprep.subr.mxu0 %v5175_v0 }
  0x46   : > { %4702 = vmatpush3.msra.mxu0 %v426_v10 }
  0x47   : > { %4703 = vmatprep.subr.mxu0 %v5175_v0 }
  0x48   : > { %4704 = vmatpush3.msra.mxu0 %v425_v11 }
  0x49   : > { %4705 = vmatprep.subr.mxu0 %v5175_v0 }
  0x4a   : > { %4706 = vmatpush3.msra.mxu0 %v424_v12 }
  0x4b   : > { %4707 = vmatprep.subr.mxu0 %v5175_v0 }
  0x4c   : > { %4708 = vmatpush3.msra.mxu0 %v423_v13 }
  0x4d   : > { %4709 = vmatprep.subr.mxu0 %v5175_v0 }
  0x4e   : > { %4710 = vmatpush3.msra.mxu0 %v422_v14 }
  0x4f   : > { %4711 = vmatprep.subr.mxu0 %v5175_v0 }
  0x50   : > { %4712 = vmatpush3.msra.mxu0 %v421_v15 }
  0x51   : > { %4713 = vmatprep.subr.mxu0 %v5175_v0 }
  0x52   : > { %4714 = vmatpush3.msra.mxu0 %v420_v16 }
  0x53   : > { %4715 = vmatprep.subr.mxu0 %v5175_v0 }
  0x54   : > { %4716 = vmatpush3.msra.mxu0 %v419_v17 }
  0x55   : > { %4717 = vmatprep.subr.mxu0 %v5175_v0 }
  0x56   : > { %4718 = vmatpush3.msra.mxu0 %v418_v18 }
  0x57   : > { %4782 = vmatprep.subr.mxu0 %v5175_v0 }
  0xc2   : > { %v406_v19 = vpop.xlane.xlu0 %405 }
  0xc3   : > { %v407_v20 = vmul.f32 0.03125, %v406_v19 }
  0xc5   : > { %v408_v21 = vadd.f32 1e-06, %v407_v20 }
  0xc7   : > { %5056 = vrsqrt.f32 %v408_v21 }
  0xd4   : > { %v5057_v22 = vpop.eup %5056 }
  0xd5   : > { %v410_v24 = vmul.f32 %v5057_v22, %v402_v1  ;;  %v4472_v1 = vld [vmem:[%s6082_s4 + $0x78] sm:$0xff] }
  0xd7   : > { %v417_v25 = vmul.f32 %v4442_v23, %v410_v24 }
  0xd9   : > { %4720 = vmatmul.mubr.f32.vlgmr.msra.gmra.mxu0 %v417_v25 }
  0xda   : > { %4784 = vmatprep.mubr.msk.f32.mxu0 %vm5176_vm0, %v5175_v0  ;;  %4783 = vmatpush3.xpose.msk.msra.mxu0 %vm518_vm1, %v4466_v29 }
  0xdb   : > { %4792 = vmatprep.subr.mxu0 %v5175_v0 }
 0x199   : > { %v507_v34 = vpop.f32.mrf.mxu0 }
 0x19a   : > { %v5444_v35 = vadd.f32 %v4443_v32, %v507_v34 }
 0x19b   : > { %v4721_v36 = vpop.f32.mrf.mxu0 }
 0x19c   : > { %516 = vrot.lane.b32.xlu0 %v5444_v35, %s5178_s15  ;;  %v609_v37 = vrot.slane %v5444_v35, %v608_v33  ;;  %v602_v38 = vcombine.high %v5444_v35, %v5444_v35 }
 0x19e   : > { %v617_v39 = vcombine.high %v609_v37, %v609_v37  ;;  %v616_v40 = vrot.slane %v602_v38, %v608_v33  ;;  %v5450_v41 = vrot.slane %v609_v37, %v608_v33 }
 0x1a0   : > { %1369 = vrot.lane.b32.xlu0 %v5444_v35, %s5179_s16  ;;  %v639_v42 = vrot.slane %v617_v39, %v608_v33  ;;  %v5456_v44 = vrot.slane %v616_v40, %v608_v33  ;;  %v618_v47 = vcombine.high %v616_v40, %v616_v40  ;;  %v5530_v62 = vcombine.high %v5450_v41, %v5450_v41 }
 0x1a2   : > { %v5459_v45 = vrot.slane %v639_v42, %v5454_v43  ;;  %v649_v46 = vcombine.high %v639_v42, %v639_v42  ;;  %v5466_v49 = vrot.slane %v618_v47, %v608_v33  ;;  %v5583_v7 = vcombine.high %v5456_v44, %v5456_v44 }
 0x1a4   : > { %1542 = vrot.lane.b32.xlu0 %v5459_v45, %s5179_s16  ;;  %v5464_v48 = vrot.slane %v649_v46, %v5454_v43  ;;  %v5472_v50 = vrot.slane %v5466_v49, %v5454_v43  ;;  %v5476_v51 = vcombine.high %v5466_v49, %v5466_v49 }
 0x1a6   : > { %v5482_v52 = vrot.slane %v5476_v51, %v5454_v43 }
 0x1a8   : > { %1704 = vrot.lane.b32.xlu0 %v5464_v48, %s5179_s16 }
 0x1ac   : > { %1866 = vrot.lane.b32.xlu0 %v5472_v50, %s5179_s16 }
 0x1b0   : > { %2028 = vrot.lane.b32.xlu0 %v5482_v52, %s5179_s16 }
 0x20e   : > { %v517_v53 = vpop.permute.xlu0 %516 }
 0x20f   : > { %4723 = vmatpush3.xpose.msk.msra.mxu1 %vm518_vm1, %v517_v53 }
 0x210   : > { %4727 = vmatprep.subr.mxu1 %v5175_v0 }
 0x212   : > { %4725 = vmatmul.mubr.msk.f32.vlgmr.msra.gmra.mxu1 %vm518_vm1, %v5444_v35  ;;  %v5493_v55 = vpop.permute.xlu0 %1369 }
 0x213   : > { %4728 = vmatpush3.xpose.msk.msra.mxu1 %vm518_vm1, %v594_v54  ;;  %4729 = vmatprep.mubr.msk.f32.mxu1 %vm5176_vm0, %v5175_v0 }
 0x214   : > { %4732 = vmatprep.subr.mxu1 %v5175_v0 }
 0x216   : > { %4730 = vmatmul.mubr.msk.f32.vlgmr.msra.gmra.mxu1 %vm518_vm1, %v5450_v41  ;;  %v1543_v58 = vpop.permute.xlu0 %1542 }
 0x217   : > { %4733 = vmatpush3.xpose.msk.msra.mxu1 %vm518_vm1, %v595_v56  ;;  %4785 = vmatmul.mubr.msk.f32.vlgmr.msra.gmra.mxu0 %vm518_vm1, %v1543_v58 }
 0x218   : > { %4793 = vmatpush3.xpose.msk.msra.mxu0 %vm518_vm1, %v4468_v57  ;;  %4734 = vmatprep.mubr.msk.f32.mxu1 %vm5176_vm0, %v5175_v0 }
 0x219   : > { %4737 = vmatprep.subr.mxu1 %v5175_v0  ;;  %4794 = vmatprep.mubr.msk.f32.mxu0 %vm5176_vm0, %v5175_v0 }
 0x21a   : > { %4735 = vmatmul.mubr.msk.f32.vlgmr.msra.gmra.mxu1 %vm518_vm1, %v639_v42  ;;  %v1705_v61 = vpop.permute.xlu0 %1704  ;;  %4802 = vmatprep.subr.mxu0 %v5175_v0 }
 0x21b   : > { %4738 = vmatpush3.xpose.msk.msra.mxu1 %vm518_vm1, %v596_v59  ;;  %4795 = vmatmul.mubr.msk.f32.vlgmr.msra.gmra.mxu0 %vm518_vm1, %v1705_v61 }
 0x21c   : > { %4803 = vmatpush3.xpose.msk.msra.mxu0 %vm518_vm1, %v4470_v60  ;;  %4739 = vmatprep.mubr.msk.f32.mxu1 %vm5176_vm0, %v5175_v0 }
 0x21d   : > { %4742 = vmatprep.subr.mxu1 %v5175_v0  ;;  %4804 = vmatprep.mubr.msk.f32.mxu0 %vm5176_vm0, %v5175_v0 }
 0x21e   : > { %4740 = vmatmul.mubr.msk.f32.vlgmr.msra.gmra.mxu1 %vm518_vm1, %v5530_v62  ;;  %v1867_v2 = vpop.permute.xlu0 %1866  ;;  %4812 = vmatprep.subr.mxu0 %v5175_v0 }
 0x21f   : > { %4743 = vmatpush3.xpose.msk.msra.mxu1 %vm518_vm1, %v597_v63  ;;  %4805 = vmatmul.mubr.msk.f32.vlgmr.msra.gmra.mxu0 %vm518_vm1, %v1867_v2 }
 0x220   : > { %4813 = vmatpush3.xpose.msk.msra.mxu0 %vm518_vm1, %v4472_v1  ;;  %4744 = vmatprep.mubr.msk.f32.mxu1 %vm5176_vm0, %v5175_v0 }
 0x221   : > { %4747 = vmatprep.subr.mxu1 %v5175_v0  ;;  %4814 = vmatprep.mubr.msk.f32.mxu0 %vm5176_vm0, %v5175_v0 }
 0x222   : > { %4745 = vmatmul.mubr.msk.f32.vlgmr.msra.gmra.mxu1 %vm518_vm1, %v649_v46  ;;  %v2029_v4 = vpop.permute.xlu0 %2028  ;;  %4822 = vmatprep.subr.mxu0 %v5175_v0 }
 0x223   : > { %4748 = vmatpush3.xpose.msk.msra.mxu1 %vm518_vm1, %v598_v3  ;;  %4815 = vmatmul.mubr.msk.f32.vlgmr.msra.gmra.mxu0 %vm518_vm1, %v2029_v4 }
 0x224   : > { %4749 = vmatprep.mubr.msk.f32.mxu1 %vm5176_vm0, %v5175_v0  ;;  %4752 = vmatprep.subr.mxu1 %v5175_v0 }
 0x225   : > { %4824 = vmatprep.mubr.msk.f32.mxu0 %vm5176_vm0, %v5175_v0 }
 0x226   : > { %4750 = vmatmul.mubr.msk.f32.vlgmr.msra.gmra.mxu1 %vm518_vm1, %v5456_v44 }
 0x227   : > { %4753 = vmatpush3.xpose.msk.msra.mxu1 %vm518_vm1, %v599_v5  ;;  %4754 = vmatprep.mubr.msk.f32.mxu1 %vm5176_vm0, %v5175_v0  ;;  %v5621_v5 = vrot.slane %v5450_v41, %v5454_v43  ;;  %v5639_v41 = vrot.slane %v5583_v7, %v5454_v43 }
 0x228   : > { %4757 = vmatprep.subr.mxu1 %v5175_v0 }
 0x22a   : > { %4755 = vmatmul.mubr.msk.f32.vlgmr.msra.gmra.mxu1 %vm518_vm1, %v5466_v49 }
 0x22b   : > { %4758 = vmatpush3.xpose.msk.msra.mxu1 %vm518_vm1, %v600_v6  ;;  %4759 = vmatprep.mubr.msk.f32.mxu1 %vm5176_vm0, %v5175_v0  ;;  %v5627_v6 = vrot.slane %v5530_v62, %v5454_v43 }
 0x22c   : > { %4762 = vmatprep.subr.mxu1 %v5175_v0 }
 0x22e   : > { %4760 = vmatmul.mubr.msk.f32.vlgmr.msra.gmra.mxu1 %vm518_vm1, %v5583_v7 }
 0x22f   : > { %4763 = vmatpush3.xpose.msk.msra.mxu1 %vm518_vm1, %v601_v8  ;;  %4764 = vmatprep.mubr.msk.f32.mxu1 %vm5176_vm0, %v5175_v0  ;;  %v5633_v8 = vrot.slane %v5456_v44, %v5454_v43  ;;  %v4465_v43 = vld [vmem:[%s6082_s4 + $0x40] sm:$0xff]  ;;  %v4467_v44 = vld [vmem:[%s6082_s4 + $0x50] sm:$0xff] }
 0x230   : > { %4767 = vmatprep.subr.mxu1 %v5175_v0 }
 0x232   : > { %4765 = vmatmul.mubr.msk.f32.vlgmr.msra.gmra.mxu1 %vm518_vm1, %v5476_v51 }
 0x233   : > { %4769 = vmatprep.mubr.msk.f32.mxu1 %vm5176_vm0, %v5175_v0 }
 0x2d2   : > { %v589_v9 = vpop.f32.mrf.mxu1 }
 0x2d3   : > { %v593_v54 = vmul.f32 2.828427, %v589_v9 }
 0x2d4   : > { %v4726_v10 = vpop.f32.mrf.mxu1 }
 0x2d6   : > { %v722_v11 = vpop.f32.mrf.mxu1 }
 0x2d7   : > { %v5599_v12 = vpop.f32.mrf.mxu0 }
 0x2d8   : > { %v4731_v13 = vpop.f32.mrf.mxu1 }
 0x2d9   : > { %v4786_v14 = vpop.f32.mrf.mxu0 }
 0x2da   : > { %v797_v15 = vpop.f32.mrf.mxu1 }
 0x2db   : > { %v5601_v16 = vpop.f32.mrf.mxu0  ;;  %v1259_v30 = vrot.slane %v797_v15, 7  ;;  %v4471_v15 = vld [vmem:[%s6082_s4 + $0x70] sm:$0xff] }
 0x2dc   : > { %v4736_v17 = vpop.f32.mrf.mxu1 }
 0x2dd   : > { %v4796_v18 = vpop.f32.mrf.mxu0  ;;  %v1261_v37 = vsel %vm1260_vm2, %v1259_v30, %v722_v11 }
 0x2de   : > { %v872_v19 = vpop.f32.mrf.mxu1 }
 0x2df   : > { %v5603_v20 = vpop.f32.mrf.mxu0  ;;  %v1262_v31 = vrot.slane %v872_v19, 6 }
 0x2e0   : > { %v4741_v21 = vpop.f32.mrf.mxu1 }
 0x2e1   : > { %v4806_v22 = vpop.f32.mrf.mxu0  ;;  %v1264_v39 = vsel %vm1263_vm3, %v1262_v31, %v1261_v37  ;;  %v2121_v37 = vrot.slane %v5603_v20, 3 }
 0x2e2   : > { %v947_v23 = vpop.f32.mrf.mxu1 }
 0x2e3   : > { %v5605_v24 = vpop.f32.mrf.mxu0  ;;  %v1265_v33 = vrot.slane %v947_v23, 5 }
 0x2e4   : > { %v4746_v25 = vpop.f32.mrf.mxu1 }
 0x2e5   : > { %v4816_v26 = vpop.f32.mrf.mxu0  ;;  %v1267_v46 = vsel %vm1266_vm4, %v1265_v33, %v1264_v39 }
 0x2e6   : > { %v1022_v27 = vpop.f32.mrf.mxu1  ;;  %v2113_v26 = vrot.slane %v5599_v12, 7 }
 0x2e7   : > { %v1268_v34 = vrot.slane %v1022_v27, 4 }
 0x2e8   : > { %v4751_v28 = vpop.f32.mrf.mxu1 }
 0x2e9   : > { %v1270_v47 = vsel %vm1269_vm5, %v1268_v34, %v1267_v46 }
 0x2ea   : > { %v1097_v29 = vpop.f32.mrf.mxu1 }
 0x2eb   : > { %v1271_v38 = vrot.slane %v1097_v29, 3  ;;  %v2117_v29 = vrot.slane %v5601_v16, 5  ;;  %v2125_v16 = vrot.slane %v5605_v24, 1 }
 0x2ec   : > { %v4756_v32 = vpop.f32.mrf.mxu1 }
 0x2ed   : > { %v1273_v51 = vsel %vm1272_vm6, %v1271_v38, %v1270_v47 }
 0x2ee   : > { %v1172_v36 = vpop.f32.mrf.mxu1 }
 0x2ef   : > { %v1274_v40 = vrot.slane %v1172_v36, 2 }
 0x2f0   : > { %v4761_v42 = vpop.f32.mrf.mxu1 }
 0x2f1   : > { %v1276_v57 = vsel %vm1275_vm7, %v1274_v40, %v1273_v51 }
 0x2f2   : > { %v1247_v49 = vpop.f32.mrf.mxu1 }
 0x2f3   : > { %v1277_v53 = vrot.slane %v1247_v49, 1 }
 0x2f4   : > { %v4766_v56 = vpop.f32.mrf.mxu1 }
 0x2f5   : > { %v1279_v58 = vsel %vm1278_vm8, %v1277_v53, %v1276_v57 }
 0x2f6   : > { %v1281_v59 = vadd.f32 %v1279_v58, %v593_v54 }
 0x2f8   : > { %v1282_v60 = vsel %vm518_vm1, %v1281_v59, -inf }
 0x2f9   : > { %1283 = vmax.xlane.f32.xlu1 %v1282_v60 }
 0x30a   : > { %1293 = vrot.lane.b32.xlu1 %v5444_v35, %s5180_s13  ;;  %s5183_s13 = smov 112  }
 0x30e   : > { %1371 = vrot.lane.b32.xlu1 %v5444_v35, %s5181_s14  ;;  %s5184_s14 = smov 56  }
 0x382   : > { %v1284_v61 = vpop.xlane.xlu1 %1283 }
 0x383   : > { %v1285_v63 = vsub.f32 %v1281_v59, %v1284_v61  ;;  %v512_v59 = vld [vmem:[%s6083_s5 + $0x8] sm:$0xff] }
 0x384   : > { %4823 = vmatpush3.msra.mxu0 %v512_v59 }
 0x385   : > { %v1286_v1 = vmul.f32 1.442695, %v1285_v63  ;;  %4832 = vmatprep.subr.mxu0 %v5175_v0 }
 0x386   : > { %v1294_v2 = vpop.permute.xlu1 %1293 }
 0x387   : > { %5058 = vpow2.f32 %v1286_v1  ;;  %4768 = vmatpush3.msra.mxu1 %v1294_v2  ;;  %v511_v2 = vld [vmem:[%s6083_s5] sm:$0xff] }
 0x388   : > { %4772 = vmatprep.subr.mxu1 %v5175_v0 }
 0x38a   : > { %v1372_v9 = vpop.permute.xlu1 %1371 }
 0x394   : > { %v5059_v3 = vpop.eup %5058 }
 0x395   : > { %v1288_v4 = vsel %vm518_vm1, %v5059_v3, 0.0 }
 0x396   : > { %1289 = vadd.xlane.f32.xlu1 %v1288_v4  ;;  %v4494_v4 = vld [vmem:[%s6082_s4 + $0x80] sm:$0xff] }
 0x3a7   : > { %1461 = vrot.lane.b32.xlu1 %v5621_v5, %s5179_s16 }
 0x3ab   : > { %1623 = vrot.lane.b32.xlu1 %v5627_v6, %s5179_s16 }
 0x3af   : > { %1785 = vrot.lane.b32.xlu1 %v5633_v8, %s5179_s16 }
 0x3b3   : > { %1947 = vrot.lane.b32.xlu1 %v5639_v41, %s5179_s16 }
 0x41f   : > { %v1290_v62 = vpop.xlane.xlu1 %1289 }
 0x420   : > { %5060 = vrcp.f32 %v1290_v62 }
 0x423   : > { %v1462_v13 = vpop.permute.xlu1 %1461 }
 0x427   : > { %v1624_v7 = vpop.permute.xlu1 %1623 }
 0x42b   : > { %v1786_v14 = vpop.permute.xlu1 %1785 }
 0x42d   : > { %v5061_v10 = vpop.eup %5060 }
 0x42e   : > { %v1292_v11 = vmul.f32 %v5061_v10, %v5059_v3  ;;  %v4498_v10 = vld [vmem:[%s6082_s4 + $0xa0] sm:$0xff] }
 0x42f   : > { %v1948_v17 = vpop.permute.xlu1 %1947 }
 0x430   : > { %4770 = vmatmul.mubr.msk.f32.vlgmr.msra.gmra.mxu1 %vm518_vm1, %v1292_v11 }
 0x431   : > { %4773 = vmatpush3.xpose.msk.msra.mxu1 %vm518_vm1, %v1372_v9  ;;  %4774 = vmatprep.mubr.msk.f32.mxu1 %vm5176_vm0, %v5175_v0  ;;  %v4496_v9 = vld [vmem:[%s6082_s4 + $0x90] sm:$0xff] }
 0x432   : > { %4777 = vmatprep.subr.mxu1 %v5175_v0 }
 0x434   : > { %4775 = vmatmul.mubr.msk.f32.vlgmr.msra.gmra.mxu1 %vm518_vm1, %v5493_v55  ;;  %v4469_v55 = vld [vmem:[%s6082_s4 + $0x60] sm:$0xff] }
 0x435   : > { %4778 = vmatpush3.xpose.msk.msra.mxu1 %vm518_vm1, %v4465_v43  ;;  %4779 = vmatprep.mubr.msk.f32.mxu1 %vm5176_vm0, %v5175_v0 }
 0x436   : > { %4787 = vmatprep.subr.mxu1 %v5175_v0 }
 0x438   : > { %4780 = vmatmul.mubr.msk.f32.vlgmr.msra.gmra.mxu1 %vm518_vm1, %v1462_v13  ;;  %v4500_v13 = vld [vmem:[%s6082_s4 + $0xb0] sm:$0xff] }
 0x439   : > { %4788 = vmatpush3.xpose.msk.msra.mxu1 %vm518_vm1, %v4467_v44  ;;  %4789 = vmatprep.mubr.msk.f32.mxu1 %vm5176_vm0, %v5175_v0 }
 0x43a   : > { %4797 = vmatprep.subr.mxu1 %v5175_v0 }
 0x43c   : > { %4790 = vmatmul.mubr.msk.f32.vlgmr.msra.gmra.mxu1 %vm518_vm1, %v1624_v7 }
 0x43d   : > { %4798 = vmatpush3.xpose.msk.msra.mxu1 %vm518_vm1, %v4469_v55  ;;  %4799 = vmatprep.mubr.msk.f32.mxu1 %vm5176_vm0, %v5175_v0 }
 0x43e   : > { %4807 = vmatprep.subr.mxu1 %v5175_v0 }
 0x440   : > { %4800 = vmatmul.mubr.msk.f32.vlgmr.msra.gmra.mxu1 %vm518_vm1, %v1786_v14 }
 0x441   : > { %4808 = vmatpush3.xpose.msk.msra.mxu1 %vm518_vm1, %v4471_v15  ;;  %4809 = vmatprep.mubr.msk.f32.mxu1 %vm5176_vm0, %v5175_v0 }
 0x442   : > { %4817 = vmatprep.subr.mxu1 %v5175_v0 }
 0x444   : > { %4810 = vmatmul.mubr.msk.f32.vlgmr.msra.gmra.mxu1 %vm518_vm1, %v1948_v17  ;;  %v4495_v17 = vld [vmem:[%s6082_s4 + $0x88] sm:$0xff] }
 0x445   : > { %4819 = vmatprep.mubr.msk.f32.mxu1 %vm5176_vm0, %v5175_v0 }
 0x4f0   : > { %v5684_v18 = vpop.f32.mrf.mxu1 }
 0x4f2   : > { %v4771_v19 = vpop.f32.mrf.mxu1 }
 0x4f4   : > { %v1443_v21 = vpop.f32.mrf.mxu1 }
 0x4f5   : > { %v1447_v47 = vmul.f32 2.828427, %v1443_v21  ;;  %v4497_v21 = vld [vmem:[%s6082_s4 + $0x98] sm:$0xff] }
 0x4f6   : > { %v4776_v22 = vpop.f32.mrf.mxu1 }
 0x4f8   : > { %v1534_v23 = vpop.f32.mrf.mxu1 }
 0x4f9   : > { %v2114_v30 = vsel %vm1260_vm2, %v2113_v26, %v1534_v23  ;;  %v4499_v26 = vld [vmem:[%s6082_s4 + $0xa8] sm:$0xff] }
 0x4fa   : > { %v4781_v25 = vpop.f32.mrf.mxu1 }
 0x4fc   : > { %v1696_v27 = vpop.f32.mrf.mxu1 }
 0x4fd   : > { %v2115_v28 = vrot.slane %v1696_v27, 6 }
 0x4fe   : > { %v4791_v31 = vpop.f32.mrf.mxu1 }
 0x4ff   : > { %v2116_v32 = vsel %vm1263_vm3, %v2115_v28, %v2114_v30  ;;  %v4501_v30 = vld [vmem:[%s6082_s4 + $0xb8] sm:$0xff] }
 0x500   : > { %v1858_v33 = vpop.f32.mrf.mxu1  ;;  %v2118_v34 = vsel %vm1266_vm4, %v2117_v29, %v2116_v32 }
 0x501   : > { %v2119_v36 = vrot.slane %v1858_v33, 4 }
 0x502   : > { %v4801_v38 = vpop.f32.mrf.mxu1 }
 0x503   : > { %v2120_v39 = vsel %vm1269_vm5, %v2119_v36, %v2118_v34 }
 0x504   : > { %v2020_v40 = vpop.f32.mrf.mxu1  ;;  %v2122_v12 = vsel %vm1272_vm6, %v2121_v37, %v2120_v39 }
 0x505   : > { %v2123_v42 = vrot.slane %v2020_v40, 2 }
 0x506   : > { %v4811_v46 = vpop.f32.mrf.mxu1 }
 0x507   : > { %v2124_v49 = vsel %vm1275_vm7, %v2123_v42, %v2122_v12 }
 0x508   : > { %v2126_v51 = vsel %vm1278_vm8, %v2125_v16, %v2124_v49 }
 0x509   : > { %v2128_v53 = vadd.f32 %v2126_v51, %v1447_v47 }
 0x50b   : > { %v2129_v54 = vsel %vm518_vm1, %v2128_v53, -inf }
 0x50c   : > { %2130 = vmax.xlane.f32.xlu1 %v2129_v54 }
 0x51d   : > { %2364 = vrot.lane.b32.xlu1 %v5444_v35, %s5182_s22  ;;  %s5188_s22 = smov 40  }
 0x521   : > { %2362 = vrot.lane.b32.xlu1 %v5444_v35, %s5183_s13 }
 0x525   : > { %2527 = vrot.lane.b32.xlu1 %v5459_v45, %s5183_s13 }
 0x529   : > { %2681 = vrot.lane.b32.xlu1 %v5464_v48, %s5183_s13 }
 0x52d   : > { %2835 = vrot.lane.b32.xlu1 %v5472_v50, %s5183_s13 }
 0x531   : > { %2989 = vrot.lane.b32.xlu1 %v5482_v52, %s5183_s13 }
 0x595   : > { %v2131_v20 = vpop.xlane.xlu1 %2130 }
 0x596   : > { %v2132_v24 = vsub.f32 %v2128_v53, %v2131_v20 }
 0x598   : > { %v2133_v56 = vmul.f32 1.442695, %v2132_v24 }
 0x599   : > { %v2365_v44 = vpop.permute.xlu1 %2364 }
 0x59a   : > { %5062 = vpow2.f32 %v2133_v56 }
 0x59d   : > { %v2363_v7 = vpop.permute.xlu1 %2362 }
 0x5a1   : > { %v2528_v14 = vpop.permute.xlu1 %2527 }
 0x5a5   : > { %v2682_v22 = vpop.permute.xlu1 %2681 }
 0x5a7   : > { %v5063_v57 = vpop.eup %5062 }
 0x5a8   : > { %v2135_v58 = vsel %vm518_vm1, %v5063_v57, 0.0 }
 0x5a9   : > { %2136 = vadd.xlane.f32.xlu0 %v2135_v58  ;;  %v2836_v28 = vpop.permute.xlu1 %2835 }
 0x5ad   : > { %v2990_v33 = vpop.permute.xlu1 %2989 }
 0x5bf   : > { %2140 = vrot.lane.b32.xlu0 %v5444_v35, %s5184_s14  ;;  %s5186_s14 = smov 104  }
 0x5c3   : > { %2450 = vrot.lane.b32.xlu0 %v5621_v5, %s5183_s13 }
 0x5c7   : > { %2604 = vrot.lane.b32.xlu0 %v5627_v6, %s5183_s13 }
 0x5cb   : > { %2758 = vrot.lane.b32.xlu0 %v5633_v8, %s5183_s13 }
 0x5cf   : > { %2912 = vrot.lane.b32.xlu0 %v5639_v41, %s5183_s13  ;;  %s5185_s13 = smov 48  }
 0x632   : > { %v2137_v60 = vpop.xlane.xlu0 %2136 }
 0x633   : > { %5064 = vrcp.f32 %v2137_v60 }
 0x636   : > { %v2141_v61 = vpop.permute.xlu0 %2140 }
 0x637   : > { %4818 = vmatpush3.msra.mxu1 %v2141_v61 }
 0x638   : > { %4827 = vmatprep.subr.mxu1 %v5175_v0 }
 0x63a   : > { %v2451_v3 = vpop.permute.xlu0 %2450 }
 0x63e   : > { %v2605_v62 = vpop.permute.xlu0 %2604 }
 0x640   : > { %v5065_v63 = vpop.eup %5064 }
 0x641   : > { %v2139_v1 = vmul.f32 %v5065_v63, %v5063_v57 }
 0x642   : > { %v2759_v11 = vpop.permute.xlu0 %2758 }
 0x643   : > { %4820 = vmatmul.mubr.msk.f32.vlgmr.msra.gmra.mxu1 %vm518_vm1, %v2139_v1 }
 0x644   : > { %4828 = vmatpush3.msra.mxu1 %v511_v2  ;;  %4829 = vmatprep.mubr.msk.f32.mxu1 %vm5176_vm0, %v5175_v0 }
 0x645   : > { %4837 = vmatprep.subr.mxu1 %v5175_v0 }
 0x646   : > { %v2913_v43 = vpop.permute.xlu0 %2912 }
 0x647   : > { %4830 = vmatmul.mubr.msk.f32.vlgmr.msra.gmra.mxu1 %vm518_vm1, %v5684_v18 }
 0x648   : > { %4838 = vmatpush3.xpose.msk.msra.mxu1 %vm518_vm1, %v4494_v4  ;;  %4839 = vmatprep.mubr.msk.f32.mxu1 %vm5176_vm0, %v5175_v0 }
 0x649   : > { %4847 = vmatprep.subr.mxu1 %v5175_v0 }
 0x64b   : > { %4840 = vmatmul.mubr.msk.f32.vlgmr.msra.gmra.mxu1 %vm518_vm1, %v2451_v3 }
 0x64c   : > { %4848 = vmatpush3.xpose.msk.msra.mxu1 %vm518_vm1, %v4496_v9  ;;  %4849 = vmatprep.mubr.msk.f32.mxu1 %vm5176_vm0, %v5175_v0 }
 0x64d   : > { %4857 = vmatprep.subr.mxu1 %v5175_v0 }
 0x64f   : > { %4850 = vmatmul.mubr.msk.f32.vlgmr.msra.gmra.mxu1 %vm518_vm1, %v2605_v62 }
 0x650   : > { %4858 = vmatpush3.xpose.msk.msra.mxu1 %vm518_vm1, %v4498_v10  ;;  %4859 = vmatprep.mubr.msk.f32.mxu1 %vm5176_vm0, %v5175_v0 }
 0x651   : > { %4867 = vmatprep.subr.mxu1 %v5175_v0 }
 0x653   : > { %4860 = vmatmul.mubr.msk.f32.vlgmr.msra.gmra.mxu1 %vm518_vm1, %v2759_v11 }
 0x654   : > { %4868 = vmatpush3.xpose.msk.msra.mxu1 %vm518_vm1, %v4500_v13  ;;  %4869 = vmatprep.mubr.msk.f32.mxu1 %vm5176_vm0, %v5175_v0 }
 0x655   : > { %4877 = vmatprep.subr.mxu1 %v5175_v0 }
 0x657   : > { %4870 = vmatmul.mubr.msk.f32.vlgmr.msra.gmra.mxu1 %vm518_vm1, %v2913_v43 }
 0x658   : > { %4879 = vmatprep.mubr.msk.f32.mxu1 %vm5176_vm0, %v5175_v0 }
 0x703   : > { %v2212_v55 = vpop.f32.mrf.mxu1 }
 0x704   : > { %4825 = vmatmul.mubr.msk.f32.vlgmr.msra.gmra.mxu0 %vm518_vm1, %v2212_v55 }
 0x705   : > { %4833 = vmatpush3.xpose.msk.msra.mxu0 %vm518_vm1, %v2365_v44  ;;  %v4821_v15 = vpop.f32.mrf.mxu1  ;;  %4834 = vmatprep.mubr.msk.f32.mxu0 %vm5176_vm0, %v5175_v0 }
 0x706   : > { %4842 = vmatprep.subr.mxu0 %v5175_v0 }
 0x707   : > { %v5766_v18 = vpop.f32.mrf.mxu1 }
 0x708   : > { %4835 = vmatmul.mubr.msk.f32.vlgmr.msra.gmra.mxu0 %vm518_vm1, %v2363_v7 }
 0x709   : > { %v4831_v19 = vpop.f32.mrf.mxu1  ;;  %4843 = vmatpush3.xpose.msk.msra.mxu0 %vm518_vm1, %v4495_v17  ;;  %4844 = vmatprep.mubr.msk.f32.mxu0 %vm5176_vm0, %v5175_v0  ;;  %v4527_v17 = vld [vmem:[%s6082_s4 + $0xe8] sm:$0xff] }
 0x70a   : > { %4852 = vmatprep.subr.mxu0 %v5175_v0 }
 0x70b   : > { %v2523_v23 = vpop.f32.mrf.mxu1 }
 0x70c   : > { %4845 = vmatmul.mubr.msk.f32.vlgmr.msra.gmra.mxu0 %vm518_vm1, %v2528_v14 }
 0x70d   : > { %v4841_v25 = vpop.f32.mrf.mxu1  ;;  %4853 = vmatpush3.xpose.msk.msra.mxu0 %vm518_vm1, %v4497_v21  ;;  %4854 = vmatprep.mubr.msk.f32.mxu0 %vm5176_vm0, %v5175_v0  ;;  %v4529_v21 = vld [vmem:[%s6082_s4 + $0xf8] sm:$0xff] }
 0x70e   : > { %4862 = vmatprep.subr.mxu0 %v5175_v0  ;;  %v4522_v25 = vld [vmem:[%s6082_s4 + $0xc0] sm:$0xff] }
 0x70f   : > { %v2677_v27 = vpop.f32.mrf.mxu1 }
 0x710   : > { %4855 = vmatmul.mubr.msk.f32.vlgmr.msra.gmra.mxu0 %vm518_vm1, %v2682_v22  ;;  %v3076_v47 = vrot.slane %v2677_v27, 6 }
 0x711   : > { %v4851_v29 = vpop.f32.mrf.mxu1  ;;  %4863 = vmatpush3.xpose.msk.msra.mxu0 %vm518_vm1, %v4499_v26  ;;  %4864 = vmatprep.mubr.msk.f32.mxu0 %vm5176_vm0, %v5175_v0 }
 0x712   : > { %4872 = vmatprep.subr.mxu0 %v5175_v0 }
 0x713   : > { %v2831_v31 = vpop.f32.mrf.mxu1 }
 0x714   : > { %4865 = vmatmul.mubr.msk.f32.vlgmr.msra.gmra.mxu0 %vm518_vm1, %v2836_v28  ;;  %v3080_v53 = vrot.slane %v2831_v31, 4  ;;  %v4524_v28 = vld [vmem:[%s6082_s4 + $0xd0] sm:$0xff] }
 0x715   : > { %v4861_v32 = vpop.f32.mrf.mxu1  ;;  %4873 = vmatpush3.xpose.msk.msra.mxu0 %vm518_vm1, %v4501_v30  ;;  %4874 = vmatprep.mubr.msk.f32.mxu0 %vm5176_vm0, %v5175_v0 }
 0x716   : > { %4882 = vmatprep.subr.mxu0 %v5175_v0  ;;  %v4526_v32 = vld [vmem:[%s6082_s4 + $0xe0] sm:$0xff] }
 0x717   : > { %v2985_v34 = vpop.f32.mrf.mxu1 }
 0x718   : > { %4875 = vmatmul.mubr.msk.f32.vlgmr.msra.gmra.mxu0 %vm518_vm1, %v2990_v33  ;;  %v3084_v59 = vrot.slane %v2985_v34, 2 }
 0x719   : > { %v4871_v36 = vpop.f32.mrf.mxu1  ;;  %4884 = vmatprep.mubr.msk.f32.mxu0 %vm5176_vm0, %v5175_v0 }
 0x7c4   : > { %v5800_v37 = vpop.f32.mrf.mxu0 }
 0x7c6   : > { %v4826_v38 = vpop.f32.mrf.mxu0 }
 0x7c7   : > { %v4528_v38 = vld [vmem:[%s6082_s4 + $0xf0] sm:$0xff] }
 0x7c8   : > { %v2436_v39 = vpop.f32.mrf.mxu0 }
 0x7c9   : > { %v2440_v3 = vmul.f32 2.828427, %v2436_v39 }
 0x7ca   : > { %v4836_v40 = vpop.f32.mrf.mxu0 }
 0x7cc   : > { %v2600_v12 = vpop.f32.mrf.mxu0 }
 0x7cd   : > { %v3074_v42 = vrot.slane %v2600_v12, 7 }
 0x7ce   : > { %v4846_v16 = vpop.f32.mrf.mxu0 }
 0x7cf   : > { %v3075_v46 = vsel %vm1260_vm2, %v3074_v42, %v2523_v23 }
 0x7d0   : > { %v2754_v49 = vpop.f32.mrf.mxu0  ;;  %v3077_v54 = vsel %vm1263_vm3, %v3076_v47, %v3075_v46 }
 0x7d1   : > { %v3078_v51 = vrot.slane %v2754_v49, 5  ;;  %v2359_v49 = vadd.f32 %v5766_v18, %v5800_v37 }
 0x7d2   : > { %v4856_v20 = vpop.f32.mrf.mxu0 }
 0x7d3   : > { %v3079_v24 = vsel %vm1266_vm4, %v3078_v51, %v3077_v54 }
 0x7d4   : > { %v2908_v56 = vpop.f32.mrf.mxu0  ;;  %v3081_v57 = vsel %vm1269_vm5, %v3080_v53, %v3079_v24 }
 0x7d5   : > { %v3082_v58 = vrot.slane %v2908_v56, 3 }
 0x7d6   : > { %v4866_v60 = vpop.f32.mrf.mxu0 }
 0x7d7   : > { %v3083_v61 = vsel %vm1272_vm6, %v3082_v58, %v3081_v57 }
 0x7d8   : > { %v3062_v63 = vpop.f32.mrf.mxu0  ;;  %v3085_v1 = vsel %vm1275_vm7, %v3084_v59, %v3083_v61 }
 0x7d9   : > { %v3086_v2 = vrot.slane %v3062_v63, 1 }
 0x7da   : > { %v4876_v4 = vpop.f32.mrf.mxu0 }
 0x7db   : > { %v3087_v9 = vsel %vm1278_vm8, %v3086_v2, %v3085_v1 }
 0x7dc   : > { %v3089_v62 = vadd.f32 %v3087_v9, %v2440_v3 }
 0x7de   : > { %v3090_v10 = vsel %vm518_vm1, %v3089_v62, -inf }
 0x7df   : > { %3091 = vmax.xlane.f32.xlu0 %v3090_v10 }
 0x7f5   : > { %3101 = vrot.lane.b32.xlu0 %v5444_v35, %s5185_s13  ;;  %s401_s13 = scalar_lea.vmem [#allocation5], %s4440_s30 }
 0x7f9   : > { %3251 = vrot.lane.b32.xlu0 %v5444_v35, %s5186_s14 }
 0x7fd   : > { %3416 = vrot.lane.b32.xlu0 %v5459_v45, %s5186_s14  ;;  %v513_v45 = vld [vmem:[%s6083_s5 + $0x10] sm:$0xff] }
 0x7fe   : > { %4883 = vmatpush3.msra.mxu0 %v513_v45 }
 0x7ff   : > { %4892 = vmatprep.subr.mxu0 %v5175_v0 }
 0x801   : > { %3570 = vrot.lane.b32.xlu0 %v5464_v48, %s5186_s14 }
 0x805   : > { %3724 = vrot.lane.b32.xlu0 %v5472_v50, %s5186_s14 }
 0x809   : > { %3878 = vrot.lane.b32.xlu0 %v5482_v52, %s5186_s14 }
 0x868   : > { %v3092_v11 = vpop.xlane.xlu0 %3091 }
 0x869   : > { %v3093_v13 = vsub.f32 %v3089_v62, %v3092_v11 }
 0x86b   : > { %v3094_v43 = vmul.f32 1.442695, %v3093_v13 }
 0x86c   : > { %v3102_v44 = vpop.permute.xlu0 %3101 }
 0x86d   : > { %5066 = vpow2.f32 %v3094_v43  ;;  %4878 = vmatpush3.msra.mxu1 %v3102_v44 }
 0x86e   : > { %4887 = vmatprep.subr.mxu1 %v5175_v0 }
 0x870   : > { %v3252_v50 = vpop.permute.xlu0 %3251 }
 0x87a   : > { %v5067_v7 = vpop.eup %5066 }
 0x87b   : > { %v3096_v55 = vsel %vm518_vm1, %v5067_v7, 0.0 }
 0x87c   : > { %3097 = vadd.xlane.f32.xlu1 %v3096_v55 }
 0x88d   : > { %3253 = vrot.lane.b32.xlu1 %v5444_v35, %s5187_s19 }
 0x891   : > { %3339 = vrot.lane.b32.xlu1 %v5621_v5, %s5186_s14  ;;  %v3417_v5 = vpop.permute.xlu0 %3416 }
 0x895   : > { %3493 = vrot.lane.b32.xlu1 %v5627_v6, %s5186_s14  ;;  %v4523_v6 = vld [vmem:[%s6082_s4 + $0xc8] sm:$0xff] }
 0x899   : > { %3647 = vrot.lane.b32.xlu1 %v5633_v8, %s5186_s14  ;;  %v4525_v8 = vld [vmem:[%s6082_s4 + $0xd8] sm:$0xff] }
 0x89d   : > { %3801 = vrot.lane.b32.xlu1 %v5639_v41, %s5186_s14  ;;  %v3571_v41 = vpop.permute.xlu0 %3570  ;;  %s4364_s14 = sshll.u32 %s401_s13, 4  ;;  %s4365_s14 = int_to_ptr.vmem [resolvable:$true] %s4364_s14 }
 0x89e   : > { %s5108_s27 = scalar_lea.vmem %s4365_s14, 128 }
 0x89f   : > { %p5109_p11 = scmp.ne.s32.totalorder %s4365_s14, %s5108_s27 }
 0x8a1   : > { %v3725_v19 = vpop.permute.xlu0 %3724  ;;  %p5110_p13 = pnand %p5109_p11, %p6108_p12 }
 0x8a3   : > { %p5111_p1 = pneg %p5110_p13 }
 0x8a5   : > { %v3879_v22 = vpop.permute.xlu0 %3878 }
 0x905   : > { %v3098_v48 = vpop.xlane.xlu1 %3097 }
 0x906   : > { %5068 = vrcp.f32 %v3098_v48 }
 0x909   : > { %v3254_v15 = vpop.permute.xlu1 %3253 }
 0x90d   : > { %v3340_v23 = vpop.permute.xlu1 %3339 }
 0x911   : > { %v3494_v29 = vpop.permute.xlu1 %3493 }
 0x913   : > { %v5069_v52 = vpop.eup %5068 }
 0x914   : > { %v3100_v14 = vmul.f32 %v5069_v52, %v5067_v7 }
 0x915   : > { %v3648_v34 = vpop.permute.xlu1 %3647 }
 0x916   : > { %4880 = vmatmul.mubr.msk.f32.vlgmr.msra.gmra.mxu1 %vm518_vm1, %v3100_v14 }
 0x917   : > { %4888 = vmatpush3.xpose.msk.msra.mxu1 %vm518_vm1, %v3254_v15  ;;  %4889 = vmatprep.mubr.msk.f32.mxu1 %vm5176_vm0, %v5175_v0 }
 0x918   : > { %4897 = vmatprep.subr.mxu1 %v5175_v0 }
 0x919   : > { %v3802_v12 = vpop.permute.xlu1 %3801 }
 0x91a   : > { %4890 = vmatmul.mubr.msk.f32.vlgmr.msra.gmra.mxu1 %vm518_vm1, %v3252_v50 }
 0x91b   : > { %4898 = vmatpush3.xpose.msk.msra.mxu1 %vm518_vm1, %v4523_v6  ;;  %4899 = vmatprep.mubr.msk.f32.mxu1 %vm5176_vm0, %v5175_v0 }
 0x91c   : > { %4907 = vmatprep.subr.mxu1 %v5175_v0 }
 0x91e   : > { %4900 = vmatmul.mubr.msk.f32.vlgmr.msra.gmra.mxu1 %vm518_vm1, %v3417_v5  ;;  %v514_v5 = vld [vmem:[%s6083_s5 + $0x18] sm:$0xff] }
 0x91f   : > { %4908 = vmatpush3.xpose.msk.msra.mxu1 %vm518_vm1, %v4525_v8  ;;  %4909 = vmatprep.mubr.msk.f32.mxu1 %vm5176_vm0, %v5175_v0 }
 0x920   : > { %4917 = vmatprep.subr.mxu1 %v5175_v0 }
 0x922   : > { %4910 = vmatmul.mubr.msk.f32.vlgmr.msra.gmra.mxu1 %vm518_vm1, %v3571_v41 }
 0x923   : > { %4918 = vmatpush3.xpose.msk.msra.mxu1 %vm518_vm1, %v4527_v17  ;;  %4919 = vmatprep.mubr.msk.f32.mxu1 %vm5176_vm0, %v5175_v0 }
 0x924   : > { %4927 = vmatprep.subr.mxu1 %v5175_v0 }
 0x926   : > { %4920 = vmatmul.mubr.msk.f32.vlgmr.msra.gmra.mxu1 %vm518_vm1, %v3725_v19 }
 0x927   : > { %4928 = vmatpush3.xpose.msk.msra.mxu1 %vm518_vm1, %v4529_v21  ;;  %4929 = vmatprep.mubr.msk.f32.mxu1 %vm5176_vm0, %v5175_v0  ;;  %v4172_v21 = vld [vmem:[%s6085_s7 + $0x78] sm:$0xff] }
 0x928   : > { %4937 = vmatprep.subr.mxu1 %v5175_v0 }
 0x92a   : > { %4930 = vmatmul.mubr.msk.f32.vlgmr.msra.gmra.mxu1 %vm518_vm1, %v3879_v22  ;;  %v4171_v22 = vld [vmem:[%s6085_s7 + $0x70] sm:$0xff] }
 0x92b   : > { %4939 = vmatprep.mubr.msk.f32.mxu1 %vm5176_vm0, %v5175_v0  ;;  %4938 = vmatpush3.msra.mxu1 %v514_v5 }
 0x92c   : > { %4977 = vmatprep.subr.mxu1 %v5175_v0 }
 0x9d6   : > { %v3173_v26 = vpop.f32.mrf.mxu1 }
 0x9d7   : > { %4885 = vmatmul.mubr.msk.f32.vlgmr.msra.gmra.mxu0 %vm518_vm1, %v3173_v26  ;;  %v4168_v26 = vld [vmem:[%s6085_s7 + $0x58] sm:$0xff] }
 0x9d8   : > { %v4881_v27 = vpop.f32.mrf.mxu1  ;;  %4893 = vmatpush3.xpose.msk.msra.mxu0 %vm518_vm1, %v4522_v25  ;;  %4894 = vmatprep.mubr.msk.f32.mxu0 %vm5176_vm0, %v5175_v0  ;;  %v4169_v25 = vld [vmem:[%s6085_s7 + $0x60] sm:$0xff] }
 0x9d9   : > { %4902 = vmatprep.subr.mxu0 %v5175_v0 }
 0x9da   : > { %v3325_v30 = vpop.f32.mrf.mxu1 }
 0x9db   : > { %4895 = vmatmul.mubr.msk.f32.vlgmr.msra.gmra.mxu0 %vm518_vm1, %v3340_v23  ;;  %v3329_v43 = vmul.f32 2.828427, %v3325_v30  ;;  %v4170_v23 = vld [vmem:[%s6085_s7 + $0x68] sm:$0xff] }
 0x9dc   : > { %v4891_v31 = vpop.f32.mrf.mxu1  ;;  %4903 = vmatpush3.xpose.msk.msra.mxu0 %vm518_vm1, %v4524_v28  ;;  %4904 = vmatprep.mubr.msk.f32.mxu0 %vm5176_vm0, %v5175_v0 }
 0x9dd   : > { %4912 = vmatprep.subr.mxu0 %v5175_v0  ;;  %v5078_v31 = vld [vmem:[%s5354_s26] sm:$0xff] }
 0x9de   : > { %v3489_v33 = vpop.f32.mrf.mxu1 }
 0x9df   : > { %4905 = vmatmul.mubr.msk.f32.vlgmr.msra.gmra.mxu0 %vm518_vm1, %v3494_v29  ;;  %v3963_v56 = vrot.slane %v3489_v33, 7  ;;  %v4548_v29 = vld [vmem:[%s6084_s6] ss:$0 sm:$0xff] }
 0x9e0   : > { %v4901_v36 = vpop.f32.mrf.mxu1  ;;  %4913 = vmatpush3.xpose.msk.msra.mxu0 %vm518_vm1, %v4526_v32  ;;  %4914 = vmatprep.mubr.msk.f32.mxu0 %vm5176_vm0, %v5175_v0 }
 0x9e1   : > { %4922 = vmatprep.subr.mxu0 %v5175_v0  ;;  %v4167_v36 = vld [vmem:[%s6085_s7 + $0x50] sm:$0xff] }
 0x9e2   : > { %v3643_v39 = vpop.f32.mrf.mxu1 }
 0x9e3   : > { %4915 = vmatmul.mubr.msk.f32.vlgmr.msra.gmra.mxu0 %vm518_vm1, %v3648_v34  ;;  %v3967_v59 = vrot.slane %v3643_v39, 5  ;;  %v4165_v39 = vld [vmem:[%s6085_s7 + $0x40] sm:$0xff] }
 0x9e4   : > { %v4911_v40 = vpop.f32.mrf.mxu1  ;;  %4923 = vmatpush3.xpose.msk.msra.mxu0 %vm518_vm1, %v4528_v38  ;;  %4924 = vmatprep.mubr.msk.f32.mxu0 %vm5176_vm0, %v5175_v0  ;;  %v4166_v38 = vld [vmem:[%s6085_s7 + $0x48] sm:$0xff] }
 0x9e5   : > { %4932 = vmatprep.subr.mxu0 %v5175_v0  ;;  %v4164_v40 = vld [vmem:[%s6085_s7 + $0x38] sm:$0xff] }
 0x9e6   : > { %v3797_v42 = vpop.f32.mrf.mxu1 }
 0x9e7   : > { %4925 = vmatmul.mubr.msk.f32.vlgmr.msra.gmra.mxu0 %vm518_vm1, %v3802_v12  ;;  %v3971_v18 = vrot.slane %v3797_v42, 3  ;;  %v4163_v12 = vld [vmem:[%s6085_s7 + $0x30] sm:$0xff]  ;;  %v4162_v42 = vld [vmem:[%s6085_s7 + $0x28] sm:$0xff] }
 0x9e8   : > { %v4921_v16 = vpop.f32.mrf.mxu1  ;;  %4934 = vmatprep.mubr.msk.f32.mxu0 %vm5176_vm0, %v5175_v0 }
 0x9e9   : > { %v4161_v16 = vld [vmem:[%s6085_s7 + $0x20] sm:$0xff] }
 0x9ea   : > { %v3951_v46 = vpop.f32.mrf.mxu1 }
 0x9eb   : > { %v3975_v11 = vrot.slane %v3951_v46, 1  ;;  %v4160_v46 = vld [vmem:[%s6085_s7 + $0x18] sm:$0xff] }
 0x9ec   : > { %v4931_v47 = vpop.f32.mrf.mxu1 }
 0x9ed   : > { %v4159_v47 = vld [vmem:[%s6085_s7 + $0x10] sm:$0xff] }
 0xa97   : > { %v3246_v51 = vpop.f32.mrf.mxu0 }
 0xa98   : > { %v5904_v53 = vadd.f32 %v3246_v51, %v2359_v49  ;;  %v4158_v49 = vld [vmem:[%s6085_s7 + $0x8] sm:$0xff]  ;;  %v4157_v51 = vld [vmem:[%s6085_s7] sm:$0xff] }
 0xa99   : > { %v4886_v54 = vpop.f32.mrf.mxu0 }
 0xa9b   : > { %v3412_v20 = vpop.f32.mrf.mxu0 }
 0xa9c   : > { %v3964_v60 = vsel %vm1260_vm2, %v3963_v56, %v3412_v20 }
 0xa9d   : > { %v4896_v24 = vpop.f32.mrf.mxu0 }
 0xa9f   : > { %v3566_v57 = vpop.f32.mrf.mxu0 }
 0xaa0   : > { %v3965_v58 = vrot.slane %v3566_v57, 6  ;;  %v5079_v57 = vld [vmem:[%s6079_s1] ss:$0 sm:$0xff] }
 0xaa1   : > { %v4906_v61 = vpop.f32.mrf.mxu0 }
 0xaa2   : > { %v3966_v63 = vsel %vm1263_vm3, %v3965_v58, %v3964_v60  ;;  %v4265_v60 = vld [vmem:[%s6087_s9 + $0x30] sm:$0xff]  ;;  %v4264_v61 = vld [vmem:[%s6087_s9 + $0x28] sm:$0xff] }
 0xaa3   : > { %v3720_v1 = vpop.f32.mrf.mxu0  ;;  %v3968_v2 = vsel %vm1266_vm4, %v3967_v59, %v3966_v63  ;;  %v4266_v59 = vld [vmem:[%s6087_s9 + $0x38] sm:$0xff]  ;;  %v4263_v63 = vld [vmem:[%s6087_s9 + $0x20] sm:$0xff] }
 0xaa4   : > { %v3969_v3 = vrot.slane %v3720_v1, 4  ;;  %v4262_v1 = vld [vmem:[%s6087_s9 + $0x18] sm:$0xff] }
 0xaa5   : > { %v4916_v37 = vpop.f32.mrf.mxu0 }
 0xaa6   : > { %v3970_v4 = vsel %vm1269_vm5, %v3969_v3, %v3968_v2  ;;  %v4261_v2 = vld [vmem:[%s6087_s9 + $0x10] sm:$0xff]  ;;  %v4260_v3 = vld [vmem:[%s6087_s9 + $0x8] sm:$0xff]  ;;  %v4549_v37 = vld [vmem:[%s6086_s8] ss:$0 sm:$0xff] }
 0xaa7   : > { %v3874_v9 = vpop.f32.mrf.mxu0  ;;  %v3972_v62 = vsel %vm1272_vm6, %v3971_v18, %v3970_v4  ;;  %v4259_v18 = vld [vmem:[%s6087_s9] sm:$0xff] }
 0xaa8   : > { %v3973_v10 = vrot.slane %v3874_v9, 2 }
 0xaa9   : > { %v4926_v13 = vpop.f32.mrf.mxu0 }
 0xaaa   : > { %v3974_v44 = vsel %vm1275_vm7, %v3973_v10, %v3972_v62 }
 0xaab   : > { %v3976_v7 = vsel %vm1278_vm8, %v3975_v11, %v3974_v44 }
 0xaac   : > { %v3978_v55 = vadd.f32 %v3976_v7, %v3329_v43 }
 0xaae   : > { %v3979_v45 = vsel %vm518_vm1, %v3978_v55, -inf }
 0xaaf   : > { %3980 = vmax.xlane.f32.xlu1 %v3979_v45 }
 0xb38   : > { %v3981_v48 = vpop.xlane.xlu1 %3980 }
 0xb39   : > { %v3982_v50 = vsub.f32 %v3978_v55, %v3981_v48  ;;  %v4550_v48 = vld [vmem:[%s6088_s10] ss:$0 sm:$0xff] }
 0xb3b   : > { %v3983_v52 = vmul.f32 1.442695, %v3982_v50 }
 0xb3d   : > { %5070 = vpow2.f32 %v3983_v52 }
 0xb4a   : > { %v5071_v14 = vpop.eup %5070 }
 0xb4b   : > { %v3985_v15 = vsel %vm518_vm1, %v5071_v14, 0.0 }
 0xb4c   : > { %3986 = vadd.xlane.f32.xlu0 %v3985_v15 }
 0xb62   : > { %3990 = vrot.lane.b32.xlu0 %v5444_v35, %s5188_s22  ;;  %s4553_s22 = sshll.u32 %s5271_s21, 7  ;;  %s5189_s21 = smov [#allocation5]  }
 0xb63   : > { %s4362_s16 = scalar_lea.hbm %s6089_s11, %s4553_s22  ;;  %s5112_s26 = sshll.u32 %s5189_s21, 4  ;;  %s5113_s26 = int_to_ptr.vmem [resolvable:$false] %s5112_s26 }
 0xb64   : > { %s5114_s30 = scalar_lea.vmem %s5113_s26, 256  ;;  %p5115_p3 = scmp.lt.s32.totalorder %s4365_s14, %s5113_s26 }
 0xb65   : > { %p5116_p5 = scmp.lt.s32.totalorder %s5114_s30, %s5108_s27 }
 0xb67   : > { %p5117_p8 = por %p5116_p5, %p5115_p3 }
 0xb69   : > { %p5118_p10 = pnand %p5117_p8, %p5111_p1 }
 0xbd5   : > { %v3987_v6 = vpop.xlane.xlu0 %3986 }
 0xbd6   : > { %5072 = vrcp.f32 %v3987_v6 }
 0xbd9   : > { %v3991_v8 = vpop.permute.xlu0 %3990 }
 0xbda   : > { %4933 = vmatpush3.msra.mxu0 %v3991_v8 }
 0xbdb   : > { %4942 = vmatprep.subr.mxu0 %v5175_v0 }
 0xbe3   : > { %v5073_v41 = vpop.eup %5072 }
 0xbe4   : > { %v3989_v17 = vmul.f32 %v5073_v41, %v5071_v14 }
 0xbe6   : > { %4935 = vmatmul.mubr.msk.f32.vlgmr.msra.gmra.mxu0 %vm518_vm1, %v3989_v17 }
 0xbe7   : > { %4974 = vmatprep.mubr.msk.f32.mxu0 %vm5176_vm0, %v5175_v0  ;;  %4943 = vmatpush3.msra.mxu0 %v4172_v21 }
 0xbe8   : > { %4944 = vmatprep.subr.mxu0 %v5175_v0 }
 0xbe9   : > { %4945 = vmatpush3.msra.mxu0 %v4171_v22 }
 0xbea   : > { %4946 = vmatprep.subr.mxu0 %v5175_v0 }
 0xbeb   : > { %4947 = vmatpush3.msra.mxu0 %v4170_v23 }
 0xbec   : > { %4948 = vmatprep.subr.mxu0 %v5175_v0 }
 0xbed   : > { %4949 = vmatpush3.msra.mxu0 %v4169_v25 }
 0xbee   : > { %4950 = vmatprep.subr.mxu0 %v5175_v0 }
 0xbef   : > { %4951 = vmatpush3.msra.mxu0 %v4168_v26 }
 0xbf0   : > { %4952 = vmatprep.subr.mxu0 %v5175_v0 }
 0xbf1   : > { %4953 = vmatpush3.msra.mxu0 %v4167_v36 }
 0xbf2   : > { %4954 = vmatprep.subr.mxu0 %v5175_v0 }
 0xbf3   : > { %4955 = vmatpush3.msra.mxu0 %v4166_v38 }
 0xbf4   : > { %4956 = vmatprep.subr.mxu0 %v5175_v0 }
 0xbf5   : > { %4957 = vmatpush3.msra.mxu0 %v4165_v39 }
 0xbf6   : > { %4958 = vmatprep.subr.mxu0 %v5175_v0 }
 0xbf7   : > { %4959 = vmatpush3.msra.mxu0 %v4164_v40 }
 0xbf8   : > { %4960 = vmatprep.subr.mxu0 %v5175_v0 }
 0xbf9   : > { %4961 = vmatpush3.msra.mxu0 %v4163_v12 }
 0xbfa   : > { %4962 = vmatprep.subr.mxu0 %v5175_v0 }
 0xbfb   : > { %4963 = vmatpush3.msra.mxu0 %v4162_v42 }
 0xbfc   : > { %4964 = vmatprep.subr.mxu0 %v5175_v0 }
 0xbfd   : > { %4965 = vmatpush3.msra.mxu0 %v4161_v16 }
 0xbfe   : > { %4966 = vmatprep.subr.mxu0 %v5175_v0 }
 0xbff   : > { %4967 = vmatpush3.msra.mxu0 %v4160_v46 }
 0xc00   : > { %4968 = vmatprep.subr.mxu0 %v5175_v0 }
 0xc01   : > { %4969 = vmatpush3.msra.mxu0 %v4159_v47 }
 0xc02   : > { %4970 = vmatprep.subr.mxu0 %v5175_v0 }
 0xc03   : > { %4971 = vmatpush3.msra.mxu0 %v4158_v49 }
 0xc04   : > { %4972 = vmatprep.subr.mxu0 %v5175_v0 }
 0xc05   : > { %4973 = vmatpush3.msra.mxu0 %v4157_v51 }
 0xca6   : > { %v4062_v35 = vpop.f32.mrf.mxu0 }
 0xca7   : > { %4940 = vmatmul.mubr.msk.f32.vlgmr.msra.gmra.mxu1 %vm518_vm1, %v4062_v35 }
 0xca8   : > { %v4936_v19 = vpop.f32.mrf.mxu0  ;;  %4993 = vmatprep.mubr.msk.f32.mxu1 %vm5176_vm0, %v5175_v0  ;;  %4978 = vmatpush3.msra.mxu1 %v4266_v59 }
 0xca9   : > { %4979 = vmatprep.subr.mxu1 %v5175_v0 }
 0xcaa   : > { %4980 = vmatpush3.msra.mxu1 %v4265_v60 }
 0xcab   : > { %4981 = vmatprep.subr.mxu1 %v5175_v0 }
 0xcac   : > { %4982 = vmatpush3.msra.mxu1 %v4264_v61 }
 0xcad   : > { %4983 = vmatprep.subr.mxu1 %v5175_v0 }
 0xcae   : > { %4984 = vmatpush3.msra.mxu1 %v4263_v63 }
 0xcaf   : > { %4985 = vmatprep.subr.mxu1 %v5175_v0 }
 0xcb0   : > { %4986 = vmatpush3.msra.mxu1 %v4262_v1 }
 0xcb1   : > { %4987 = vmatprep.subr.mxu1 %v5175_v0 }
 0xcb2   : > { %4988 = vmatpush3.msra.mxu1 %v4261_v2 }
 0xcb3   : > { %4989 = vmatprep.subr.mxu1 %v5175_v0 }
 0xcb4   : > { %4990 = vmatpush3.msra.mxu1 %v4260_v3 }
 0xcb5   : > { %4991 = vmatprep.subr.mxu1 %v5175_v0 }
 0xcb6   : > { %4992 = vmatpush3.msra.mxu1 %v4259_v18 }
 0xd67   : > { %v4135_v27 = vpop.f32.mrf.mxu1 }
 0xd68   : > { %v4139_v28 = vadd.f32 %v4135_v27, %v5904_v53 }
 0xd69   : > { %v4941_v30 = vpop.f32.mrf.mxu1 }
 0xd6a   : > { %v4140_v32 = vadd.f32 %v5078_v31, %v4139_v28 }
 0xd6c   : > { %v5952_v33 = vadd.f32 %v4548_v29, %v4140_v32 }
 0xd6e   : > { %v4149_v34 = vmul.f32 %v5952_v33, %v5952_v33 }
 0xd70   : > { %4150 = vadd.xlane.f32.xlu1 %v4149_v34 }
 0xdf9   : > { %v4151_v53 = vpop.xlane.xlu1 %4150 }
 0xdfa   : > { %v4152_v54 = vmul.f32 0.03125, %v4151_v53 }
 0xdfc   : > { %v4153_v20 = vadd.f32 1e-06, %v4152_v54 }
 0xdfe   : > { %5074 = vrsqrt.f32 %v4153_v20 }
 0xe0b   : > { %v5075_v24 = vpop.eup %5074 }
 0xe0c   : > { %v4155_v56 = vmul.f32 %v5075_v24, %v5952_v33 }
 0xe0e   : > { %v4156_v58 = vmul.f32 %v5079_v57, %v4155_v56 }
 0xe10   : > { %4975 = vmatmul.mubr.f32.vlgmr.msra.gmra.mxu0 %v4156_v58 }
 0xed0   : > { %v4246_v4 = vpop.f32.mrf.mxu0 }
 0xed1   : > { %v4247_v9 = vadd.f32 %v4549_v37, %v4246_v4 }
 0xed2   : > { %v4976_v62 = vpop.f32.mrf.mxu0 }
 0xed3   : > { %v4251_v10 = vmul.f32 0.044715, %v4247_v9  ;;  %v4250_v55 = vmul.f32 0.5, %v4247_v9 }
 0xed5   : > { %v4252_v11 = vmul.f32 %v4251_v10, %v4247_v9 }
 0xed7   : > { %v4253_v13 = vmul.f32 %v4252_v11, %v4247_v9 }
 0xed9   : > { %v4254_v43 = vadd.f32 %v4253_v13, %v4247_v9 }
 0xedb   : > { %v4255_v44 = vmul.f32 0.7978846, %v4254_v43 }
 0xedd   : > { %5076 = vtanh.f32 %v4255_v44 }
 0xeea   : > { %v5077_v7 = vpop.eup %5076 }
 0xeeb   : > { %v4257_v0 = vadd.f32 1.0, %v5077_v7 }
 0xeed   : > { %v4258_v45 = vmul.f32 %v4257_v0, %v4250_v55 }
 0xeef   : > { %4994 = vmatmul.mubr.msk.f32.vlgmr.msra.gmra.mxu1 %vm4274_vm9, %v4258_v45 }
 0xfaf   : > { %v4344_v50 = vpop.f32.mrf.mxu1 }
 0xfb0   : > { %v4345_v52 = vadd.f32 %v4550_v48, %v4344_v50 }
 0xfb1   : > { %v4995_v14 = vpop.f32.mrf.mxu1 }
 0xfb2   : > { %v4348_v15 = vadd.f32 %v4345_v52, %v5952_v33 }
 0xfb4   : > { %4349 = vst [vmem:[%s401_s13] sm:$0xff] %v4348_v15 }
 0xfb5   : > { %5121 = shalt.err (!%p5118_p10)
}
 0xfb6   : > { %s5122_s28 = scalar_lea.hbm %s4362_s16, 128  ;;  %s5126_s12 = scalar_lea.hbm %s6089_s11, 256 }
 0xfb7   : > { %p5123_p2 = scmp.ne.s32.totalorder %s4362_s16, %s5122_s28  ;;  %p5127_p7 = scmp.lt.s32.totalorder %s4362_s16, %s6089_s11 }
 0xfb8   : > { %p5128_p0 = scmp.lt.s32.totalorder %s5126_s12, %s5122_s28 }
 0xfb9   : > { %p5124_p4 = pnand %p5123_p2, %p6108_p12 }
 0xfba   : > { %p5129_p6 = por %p5128_p0, %p5127_p7 }
 0xfbb   : > { %p5125_p9 = pneg %p5124_p4 }
 0xfbd   : > { %p5130_p11 = pnand %p5129_p6, %p5125_p9 }
 0xfbf   : > { %5133 = shalt.err (!%p5130_p11)
}
 0xfc0   : > { %4998 = dma.vmem_to_hbm [thread:$0]  (%p6108_p12), %s4365_s14, 128, %s4362_s16, %s4351_s25  }
 0xfc1 PF: > { %s6109_s19 = sld [smem:[#allocation11_spill]]  ;;  %s4376_s24 = sand.u32 1, %s5160_s17  }
 0xfc2   : > { %p6111_p1 = scmp.ge.s32.totalorder %s5172_s20, 2  ;;  %s4377_s27 = scalar_lea.sflag [#allocation4], %s4376_s24 }
 0xfc7   : > { %p6110_p13 = scmp.ne.s32.totalorder %s6109_s19, 0 }
 0xfc9   : > { %p5005_p3 = pnand %p6111_p1, %p6110_p13 }
 0xfcb   : > { %p5006_p5 = pneg %p5005_p3 }
 0xfcd   : > { %5155 = dma.done.wait (%p5006_p5), %s4377_s27, 128  }
 0xfce   : > { %5157 = vsyncadd (%p5006_p5), %s4377_s27, 4294967168  ;;  %s6112_s20 = sld [smem:[#allocation9_spill]]  ;;  %s6115_s17 = smov %s5164_s18 }
 0xfcf   : > { %s6113_s21 = sld [smem:[#allocation8_spill]] }
 0xfd0   : > { %s6114_s19 = sld [smem:[#allocation10_spill]] }
 0xfd4   : > { %p24_p8 = scmp.ge.s32.totalorder %s6112_s20, 4  }
 0xfd5   : > { %s6116_s18 = smov %s6113_s21 }
 0xfd6   :  { %26 = sbr.rel (!%p24_p8) target bundleno = 5 (0x5), region = 112 }
 0xfdb   :  { %4382 = vsyncpa [#allocation3], 1 }
 0xfdc   :  { %4384 = vsyncpa [#allocation3 + $0x1], 1 }
 0xfdd   :  { %4385 = vsyncpa [#allocation4], 1 }
 0xfde   :  { %4387 = vsyncpa [#allocation4 + $0x1], 1 }

</bundles_post_ra>
